<compile_context>
chip_gen: v5e
topology: v5e:2x2
jax: 0.10.0
libtpu: 0.0.40
codegen_flags: <defaults>
</compile_context>

<pallas_src>
import functools
import jax
import jax.numpy as jnp
from jax.experimental import pallas as pl
from jax.experimental.pallas import tpu as pltpu


# ----------------------------------------------------------------------------- helpers
def _const_specs(arrays):
    """Full-array BlockSpecs with constant index maps for a grid=(1,) call."""
    specs = []
    for a in arrays:
        nd = a.ndim
        specs.append(pl.BlockSpec(a.shape, lambda i, _nd=nd: (0,) * _nd))
    return specs


# ----------------------------------------------------------------------------- Kernel A: bi-LSTM encoder (+ c/h reduce)
def _bilstm_kernel(x_ref, wfw_ref, bfw_ref, wbw_ref, bbw_ref,
                   crw_ref, crb_ref, hrw_ref, hrb_ref,
                   y_ref, enc_ref, *, hdim):
    T, B, _ = x_ref.shape
    zeros = jnp.zeros((B, hdim), jnp.float32)
    h_fw, c_fw = zeros, zeros
    h_bw, c_bw = zeros, zeros
    wfw, bfw = wfw_ref[...], bfw_ref[...]
    wbw, bbw = wbw_ref[...], bbw_ref[...]

    def step(x_t, h, c, w, b):
        # single MXU matmul for all 4 gates: [x|h] @ [Wih; Whh] + b
        g = jnp.dot(jnp.concatenate([x_t, h], axis=1), w,
                    preferred_element_type=jnp.float32) + b
        i = jax.nn.sigmoid(g[:, 0:hdim])
        f = jax.nn.sigmoid(g[:, hdim:2 * hdim])
        gg = jnp.tanh(g[:, 2 * hdim:3 * hdim])
        o = jax.nn.sigmoid(g[:, 3 * hdim:4 * hdim])
        c_new = f * c + i * gg
        h_new = o * jnp.tanh(c_new)
        return h_new, c_new

    y_fw = [None] * T
    y_bw = [None] * T
    for t in range(T):                      # statically unrolled recurrence
        h_fw, c_fw = step(x_ref[t], h_fw, c_fw, wfw, bfw)
        y_fw[t] = h_fw
        tb = T - 1 - t                      # backward direction, no reversed copy
        h_bw, c_bw = step(x_ref[tb], h_bw, c_bw, wbw, bbw)
        y_bw[tb] = h_bw

    for t in range(T):
        y_ref[t] = jnp.concatenate([y_fw[t], y_bw[t]], axis=1)

    c_cat = jnp.concatenate([c_fw, c_bw], axis=1)
    h_cat = jnp.concatenate([h_fw, h_bw], axis=1)
    ec = jnp.maximum(jnp.dot(c_cat, crw_ref[...],
                             preferred_element_type=jnp.float32) + crb_ref[...], 0.0)
    eh = jnp.maximum(jnp.dot(h_cat, hrw_ref[...],
                             preferred_element_type=jnp.float32) + hrb_ref[...], 0.0)
    enc_ref[...] = jnp.concatenate([ec, eh], axis=1)


def pallas_bilstm_encoder(x_tbe, w_fw, b_fw, w_bw, b_bw, crw, crb, hrw, hrb, hdim):
    T, B, _ = x_tbe.shape
    args = (x_tbe, w_fw, b_fw, w_bw, b_bw, crw, crb, hrw, hrb)
    return pl.pallas_call(
        functools.partial(_bilstm_kernel, hdim=hdim),
        out_shape=(jax.ShapeDtypeStruct((T, B, 2 * hdim), jnp.float32),
                   jax.ShapeDtypeStruct((B, 2 * hdim), jnp.float32)),
        grid=(1,),
        in_specs=_const_specs(args),
        out_specs=(pl.BlockSpec((T, B, 2 * hdim), lambda i: (0, 0, 0)),
                   pl.BlockSpec((B, 2 * hdim), lambda i: (0, 0))),
    )(*args)


# ----------------------------------------------------------------------------- Kernel B: fused graph message passing (+ reduce)
def _graph_kernel(hsl_ref, oh_sc_ref, oh_sp_ref, oh_uc_ref, oh_up_ref,
                  r_s1_ref, r_u1_ref, r_s2_ref, r_u2_ref,
                  wcp_ref, bcp_ref, wpc_ref, bpc_ref,
                  wucp_ref, bucp_ref, wupc_ref, bupc_ref,
                  redw_ref, redb_ref, out_ref,
                  *, dh, n_gram, use_norm, user_struct, alpha):
    hsl = hsl_ref[...]
    oh_sc, oh_sp = oh_sc_ref[...], oh_sp_ref[...]
    oh_uc, oh_up = oh_uc_ref[...], oh_up_ref[...]
    r_s1, r_u1 = r_s1_ref[...], r_u1_ref[...]
    r_s2, r_u2 = r_s2_ref[...], r_u2_ref[...]

    def gru(x, h, w, b):
        # block-diagonal [x|h] weight -> gi|gh from one MXU matmul
        g = jnp.dot(jnp.concatenate([x, h], axis=1), w,
                    preferred_element_type=jnp.float32) + b
        gi, gh = g[:, :3 * dh], g[:, 3 * dh:]
        r = jax.nn.sigmoid(gi[:, 0:dh] + gh[:, 0:dh])
        z = jax.nn.sigmoid(gi[:, dh:2 * dh] + gh[:, dh:2 * dh])
        n = jnp.tanh(gi[:, 2 * dh:] + r * gh[:, 2 * dh:])
        return (1.0 - z) * n + z * h

    def msg(oh_x, oh_h, w, b, rmat, hsl_cur):
        # gather rows via one-hot matmul, GRU, masked sum via reduction matrix.
        x = jnp.dot(oh_x, hsl_cur, preferred_element_type=jnp.float32)
        h = jnp.dot(oh_h, hsl_cur, preferred_element_type=jnp.float32)
        chg = gru(x, h, w, b)
        return jnp.dot(rmat, chg, preferred_element_type=jnp.float32)  # (B+1, 2H), row0 = 0

    def nscale(chg):
        nrm = jnp.sqrt(jnp.sum(chg * chg, axis=1, keepdims=True))
        return (nrm + alpha) / (nrm + 1.0)

    # ---- first n_gram loop: child -> parent ----
    for _ in range(n_gram):
        enc_p = msg(oh_sc, oh_sp, wcp_ref[...], bcp_ref[...], r_s1, hsl)
        dn_sent = nscale(enc_p) if use_norm else None
        if (not user_struct) and use_norm:
            hsl = hsl + enc_p * dn_sent
        elif (not user_struct) and (not use_norm):
            hsl = hsl + enc_p
        if user_struct:
            enc_up = msg(oh_uc, oh_up, wucp_ref[...], bucp_ref[...], r_u1, hsl)
            if use_norm:
                hsl = hsl + enc_up * nscale(enc_up) + enc_p * dn_sent
            else:
                hsl = hsl + enc_up + enc_p

    # ---- second n_gram loop: parent -> child (user part unconditional, as in reference) ----
    for _ in range(n_gram):
        enc_c = msg(oh_sp, oh_sc, wpc_ref[...], bpc_ref[...], r_s2, hsl)
        dn_sent = nscale(enc_c) if use_norm else None
        if (not user_struct) and use_norm:
            hsl = hsl + enc_c * dn_sent
        elif (not user_struct) and (not use_norm):
            hsl = hsl + enc_c
        enc_uc = msg(oh_up, oh_uc, wupc_ref[...], bupc_ref[...], r_u2, hsl)
        if use_norm:
            hsl = hsl + enc_uc * nscale(enc_uc) + enc_c * dn_sent
        else:
            hsl = hsl + enc_uc + enc_c

    out_ref[...] = jnp.maximum(
        jnp.dot(hsl, redw_ref[...], preferred_element_type=jnp.float32) + redb_ref[...], 0.0)


def pallas_graph_message_passing(args, hdim, n_gram, use_norm, user_struct, alpha):
    nrows = args[0].shape[0]
    return pl.pallas_call(
        functools.partial(_graph_kernel, dh=2 * hdim, n_gram=n_gram,
                          use_norm=use_norm, user_struct=user_struct, alpha=alpha),
        out_shape=jax.ShapeDtypeStruct((nrows, hdim), jnp.float32),
        grid=(1,),
        in_specs=_const_specs(args),
        out_specs=pl.BlockSpec((nrows, hdim), lambda i: (0, 0)),
    )(*args)


# ----------------------------------------------------------------------------- Kernel C: fused attention decoder
def _decoder_kernel(emb_ref, h0_ref, enc_ref, mask_ref,
                    encw_ref, encb_ref, decw_ref, v_ref,
                    gruw_ref, grub_ref, outw_ref, outb_ref,
                    vocw_ref, vocb_ref,
                    o_ref, h_sc, ep_sc, *, hdim):
    t = pl.program_id(0)
    nt = enc_ref.shape[0]

    @pl.when(t == 0)
    def _():
        h_sc[...] = h0_ref[...]
        # encoder attention projection computed once, kept resident in VMEM scratch.
        for n in range(nt):  # unrolled over tiny num_tgt batch -> pure 2-D MXU dots
            ep_sc[n] = jnp.dot(enc_ref[n], encw_ref[...],
                               preferred_element_type=jnp.float32) + encb_ref[...]

    h = h_sc[...]

    # ---- Bahdanau attention ----
    hq = jnp.dot(h, decw_ref[...], preferred_element_type=jnp.float32)          # (nt, H)
    e = jnp.tanh(ep_sc[...] + hq[:, None, :])                                   # (nt, T, H)
    scores = jnp.sum(e * v_ref[...][None, :, :], axis=-1)                       # (nt, T)
    scores = jnp.where(mask_ref[...] > 0.0, scores, -1e9)
    m = jnp.max(scores, axis=-1, keepdims=True)
    ex = jnp.exp(scores - m)
    attn = ex / jnp.sum(ex, axis=-1, keepdims=True)                             # (nt, T)
    # context via MXU (unrolled batched (1,T)@(T,2H) matmuls)
    ctx = jnp.concatenate(
        [jnp.dot(attn[n:n + 1, :], enc_ref[n], preferred_element_type=jnp.float32)
         for n in range(nt)], axis=0)                                           # (nt, 2H)

    # ---- GRU cell (block-diagonal fused gate matmul) ----
    x_t = jnp.concatenate([emb_ref[0], ctx], axis=1)                            # (nt, E+2H)
    g = jnp.dot(jnp.concatenate([x_t, h], axis=1), gruw_ref[...],
                preferred_element_type=jnp.float32) + grub_ref[...]
    gi, gh = g[:, :3 * hdim], g[:, 3 * hdim:]
    r = jax.nn.sigmoid(gi[:, 0:hdim] + gh[:, 0:hdim])
    z = jax.nn.sigmoid(gi[:, hdim:2 * hdim] + gh[:, hdim:2 * hdim])
    n_ = jnp.tanh(gi[:, 2 * hdim:] + r * gh[:, 2 * hdim:])
    h_new = (1.0 - z) * n_ + z * h
    h_sc[...] = h_new

    # ---- output projection + vocab softmax ----
    out_t = jnp.dot(jnp.concatenate([h_new, ctx], axis=1), outw_ref[...],
                    preferred_element_type=jnp.float32) + outb_ref[...]         # (nt, H)
    logits = jnp.dot(out_t, vocw_ref[...],
                     preferred_element_type=jnp.float32) + vocb_ref[...]        # (nt, V)
    lm = jnp.max(logits, axis=-1, keepdims=True)
    le = jnp.exp(logits - lm)
    o_ref[0] = le / jnp.sum(le, axis=-1, keepdims=True)


def pallas_attention_decoder(emb_dec_tm, h0, enc_state, attn_mask,
                             encw, encb, decw, v, gruw, grub, outw, outb,
                             vocw, vocb, hdim):
    dec_T, nt, E = emb_dec_tm.shape
    _, T, enc_dim = enc_state.shape
    V = vocw.shape[1]
    const = lambda shape: pl.BlockSpec(shape, lambda t, _nd=len(shape): (0,) * _nd)
    return pl.pallas_call(
        functools.partial(_decoder_kernel, hdim=hdim),
        out_shape=jax.ShapeDtypeStruct((dec_T, nt, V), jnp.float32),
        grid=(dec_T,),
        in_specs=[
            pl.BlockSpec((1, nt, E), lambda t: (t, 0, 0)),
            const(h0.shape), const(enc_state.shape), const(attn_mask.shape),
            const(encw.shape), const(encb.shape), const(decw.shape), const(v.shape),
            const(gruw.shape), const(grub.shape), const(outw.shape), const(outb.shape),
            const(vocw.shape), const(vocb.shape),
        ],
        out_specs=pl.BlockSpec((1, nt, V), lambda t: (t, 0, 0)),
        scratch_shapes=[pltpu.VMEM((nt, hdim), jnp.float32),
                        pltpu.VMEM((nt, T, hdim), jnp.float32)],
        compiler_params=pltpu.CompilerParams(dimension_semantics=("arbitrary",)),
    )(emb_dec_tm, h0, enc_state, attn_mask, encw, encb, decw, v,
      gruw, grub, outw, outb, vocw, vocb)


# ----------------------------------------------------------------------------- params
def init_params(key, cfg, vsize):
    H, E = cfg['sen_hidden_dim'], cfg['emb_dim']
    state = {'key': key}

    def mat(shape, scale=0.1):
        state['key'], sub = jax.random.split(state['key'])
        return jax.random.normal(sub, shape, jnp.float32) * scale

    p = {'embeddings': mat((vsize, E))}
    for d in ('fw', 'bw'):
        p[f'lstm_{d}_wih'] = mat((E, 4 * H))
        p[f'lstm_{d}_whh'] = mat((H, 4 * H))
        p[f'lstm_{d}_b'] = mat((1, 4 * H))   # merged b_ih + b_hh
    p['c_reduce_w'], p['c_reduce_b'] = mat((2 * H, H)), mat((1, H))
    p['h_reduce_w'], p['h_reduce_b'] = mat((2 * H, H)), mat((1, H))
    for name in ('cell_c_p', 'cell_p_c', 'cell_user_c_p', 'cell_user_p_c'):
        p[name] = dict(wih=mat((2 * H, 6 * H)), whh=mat((2 * H, 6 * H)),
                       bih=mat((1, 6 * H)), bhh=mat((1, 6 * H)))
    p['reduce_w'], p['reduce_b'] = mat((2 * H, H)), mat((1, H))
    enc_dim = 2 * H
    p['attn_enc_w'], p['attn_enc_b'] = mat((enc_dim, H)), mat((1, H))
    p['attn_dec_w'], p['attn_v'] = mat((H, H)), mat((1, H))
    p['dec_gru'] = dict(wih=mat((E + enc_dim, 3 * H)), whh=mat((H, 3 * H)),
                        bih=mat((1, 3 * H)), bhh=mat((1, 3 * H)))
    p['dec_out_w'], p['dec_out_b'] = mat((H + enc_dim, H)), mat((1, H))
    p['output_reduce_w'], p['output_reduce_b'] = mat((H, vsize)), mat((1, vsize))
    return p


def _blockdiag_gru(cell, din, dh):
    """[x|h] @ [[Wih,0],[0,Whh]] + [bih|bhh] -> [gi|gh] in a single matmul."""
    w = jnp.concatenate([
        jnp.concatenate([cell['wih'], jnp.zeros((din, 3 * dh), jnp.float32)], axis=1),
        jnp.concatenate([jnp.zeros((dh, 3 * dh), jnp.float32), cell['whh']], axis=1)],
        axis=0)
    b = jnp.concatenate([cell['bih'], cell['bhh']], axis=1)
    return w, b


# ----------------------------------------------------------------------------- forward
def gsn_forward(params, batch, cfg):
    H = cfg['sen_hidden_dim']
    E = cfg['emb_dim']
    BB = cfg['branch_batch_size']
    SB = cfg['sen_batch_size']
    T = cfg['max_enc_steps']
    B = BB * SB

    emb = params['embeddings']
    emb_enc_inputs = emb[batch['enc_batch']].reshape(B, T, E)
    emb_dec_inputs = emb[batch['dec_batch']]                       # (num_tgt, Td, E)

    # ---- Kernel A: fused bi-LSTM encoder + c/h reduce ----
    x_tbe = jnp.transpose(emb_enc_inputs, (1, 0, 2))               # (T, B, E)
    w_fw = jnp.concatenate([params['lstm_fw_wih'], params['lstm_fw_whh']], axis=0)
    w_bw = jnp.concatenate([params['lstm_bw_wih'], params['lstm_bw_whh']], axis=0)
    y, enc_states = pallas_bilstm_encoder(
        x_tbe, w_fw, params['lstm_fw_b'], w_bw, params['lstm_bw_b'],
        params['c_reduce_w'], params['c_reduce_b'],
        params['h_reduce_w'], params['h_reduce_b'], H)
    sen_enc_states = jnp.transpose(y, (1, 0, 2))                   # (B, T, 2H)

    hsl0 = jnp.concatenate([jnp.zeros((1, 2 * H), jnp.float32), enc_states], axis=0)

    # ---- graph index preparation (tiny, plain JAX) ----
    struct_child = jnp.matmul(batch['state_matrix'], batch['struct_conv']).astype(jnp.int32)
    struct_parent = jnp.matmul(batch['struct_conv'], batch['state_matrix']).astype(jnp.int32)
    relate_user_child = jnp.matmul(batch['relate_user'], batch['struct_conv']).astype(jnp.int32)
    relate_user_parent = jnp.matmul(batch['struct_conv'], batch['relate_user']).astype(jnp.int32)

    nrows = B + 1
    N = BB * SB * SB
    onehot = lambda idx: jax.nn.one_hot(idx.reshape(-1), nrows, dtype=jnp.float32)
    oh_sc, oh_sp = onehot(struct_child), onehot(struct_parent)
    oh_uc, oh_up = onehot(relate_user_child), onehot(relate_user_parent)

    eyeb, eyes = jnp.eye(BB, dtype=jnp.float32), jnp.eye(SB, dtype=jnp.float32)

    def reduce_mat(mask, axis):
        m = mask[..., 0]                                            # (BB, SB, SB)
        if axis == 1:   # out[b, j] = sum_i m[b,i,j] * chg[b,i,j]
            R = jnp.einsum('bij,bc,jk->bjcik', m, eyeb, eyes).reshape(B, N)
        else:           # out[b, i] = sum_j m[b,i,j] * chg[b,i,j]
            R = jnp.einsum('bij,bc,ik->bickj', m, eyeb, eyes).reshape(B, N)
        return jnp.concatenate([jnp.zeros((1, N), jnp.float32), R], axis=0)  # zero row -> zero_emb

    r_s1 = reduce_mat(batch['mask_emb'], 1)
    r_u1 = reduce_mat(batch['mask_user'], 1)
    r_s2 = reduce_mat(batch['mask_emb'], 2)
    r_u2 = reduce_mat(batch['mask_user'], 2)

    wcp, bcp = _blockdiag_gru(params['cell_c_p'], 2 * H, 2 * H)
    wpc, bpc = _blockdiag_gru(params['cell_p_c'], 2 * H, 2 * H)
    wucp, bucp = _blockdiag_gru(params['cell_user_c_p'], 2 * H, 2 * H)
    wupc, bupc = _blockdiag_gru(params['cell_user_p_c'], 2 * H, 2 * H)

    # ---- Kernel B: fused graph message passing + reduce ----
    graph_args = (hsl0, oh_sc, oh_sp, oh_uc, oh_up, r_s1, r_u1, r_s2, r_u2,
                  wcp, bcp, wpc, bpc, wucp, bucp, wupc, bupc,
                  params['reduce_w'], params['reduce_b'])
    new_hidden_state = pallas_graph_message_passing(
        graph_args, H, cfg['n_gram'], cfg['use_norm'], cfg['user_struct'],
        cfg['norm_alpha'])                                          # (B+1, H)

    dec_hidden_state_init = new_hidden_state[batch['tgt_index'] + 1]      # (num_tgt, H)
    # long_attn = False path
    enc_state = sen_enc_states[batch['tgt_index']]                        # (num_tgt, T, 2H)
    attn_mask = batch['attn_mask'].reshape(-1, T)[batch['tgt_index']]     # (num_tgt, T)

    # ---- Kernel C: fused attention decoder + vocab softmax ----
    emb_dec_tm = jnp.transpose(emb_dec_inputs, (1, 0, 2))                 # (Td, num_tgt, E)
    wg, bg = _blockdiag_gru(params['dec_gru'], E + 2 * H, H)
    vocab = pallas_attention_decoder(
        emb_dec_tm, dec_hidden_state_init, enc_state, attn_mask,
        params['attn_enc_w'], params['attn_enc_b'],
        params['attn_dec_w'], params['attn_v'],
        wg, bg, params['dec_out_w'], params['dec_out_b'],
        params['output_reduce_w'], params['output_reduce_b'], H)          # (Td, num_tgt, V)

    dec_T = vocab.shape[0]
    return [vocab[i] for i in range(dec_T)]


# ----------------------------------------------------------------------------- main
if __name__ == "__main__":
    cfg = dict(
        dropout=0.0,
        sen_hidden_dim=32,
        branch_batch_size=2,
        sen_batch_size=4,
        max_enc_steps=8,
        emb_dim=32,
        positional_enc=False,
        positional_enc_dim=0,
        n_gram=2,
        use_norm=True,
        user_struct=True,
        long_attn=False,
        norm_alpha=0.5,
    )
    vsize = 64
    BB, SB, T = cfg['branch_batch_size'], cfg['sen_batch_size'], cfg['max_enc_steps']
    num_tgt, dec_T = 2, 4

    key = jax.random.PRNGKey(0)
    k_param, k_enc, k_dec = jax.random.split(key, 3)
    params = init_params(k_param, cfg, vsize)

    # graph index matrices: node ids in [0, BB*SB]; struct_conv = cyclic permutation
    ii = jnp.arange(SB)
    state_matrix = jnp.stack(
        [((b * SB + (ii[:, None] + ii[None, :]) % SB) + 1).astype(jnp.float32) for b in range(BB)], axis=0)
    relate_user = jnp.stack(
        [((b * SB + (2 * ii[:, None] + ii[None, :]) % SB) + 1).astype(jnp.float32) for b in range(BB)], axis=0)
    perm = jnp.zeros((SB, SB), jnp.float32).at[ii, (ii + 1) % SB].set(1.0)
    struct_conv = jnp.broadcast_to(perm, (BB, SB, SB))

    mask_emb = (ii[None, :] <= ii[:, None]).astype(jnp.float32)[None, :, :, None]
    mask_emb = jnp.broadcast_to(mask_emb, (BB, SB, SB, 1))
    mask_user = (ii[None, :] >= ii[:, None]).astype(jnp.float32)[None, :, :, None]
    mask_user = jnp.broadcast_to(mask_user, (BB, SB, SB, 1))

    attn_mask = jnp.ones((BB * SB, T), jnp.float32).at[:, T - 1].set(0.0)

    batch = dict(
        enc_batch=jax.random.randint(k_enc, (BB * SB, T), 0, vsize),
        dec_batch=jax.random.randint(k_dec, (num_tgt, dec_T), 0, vsize),
        state_matrix=state_matrix,
        struct_conv=struct_conv,
        relate_user=relate_user,
        mask_emb=mask_emb,
        mask_user=mask_user,
        attn_mask=attn_mask,
        tgt_index=jnp.array([0, 5], jnp.int32),
    )

    vocab_dists = gsn_forward(params, batch, cfg)
    vocab_dists = [jax.block_until_ready(v) for v in vocab_dists]
    assert len(vocab_dists) == dec_T
    assert vocab_dists[0].shape == (num_tgt, vsize)
    assert bool(jnp.all(jnp.isfinite(jnp.stack(vocab_dists))))
    print("KERNEL_OK")
</pallas_src>

<mosaic_0001>
module attributes {stable_mosaic.version = 11 : i64} {
  func.func @_bilstm_kernel(%arg0: i32, %arg1: memref<8x8x32xf32, #tpu.memory_space<vmem>>, %arg2: memref<64x128xf32, #tpu.memory_space<vmem>>, %arg3: memref<1x128xf32, #tpu.memory_space<vmem>>, %arg4: memref<64x128xf32, #tpu.memory_space<vmem>>, %arg5: memref<1x128xf32, #tpu.memory_space<vmem>>, %arg6: memref<64x32xf32, #tpu.memory_space<vmem>>, %arg7: memref<1x32xf32, #tpu.memory_space<vmem>>, %arg8: memref<64x32xf32, #tpu.memory_space<vmem>>, %arg9: memref<1x32xf32, #tpu.memory_space<vmem>>, %arg10: memref<8x8x64xf32, #tpu.memory_space<vmem>>, %arg11: memref<8x64xf32, #tpu.memory_space<vmem>>) attributes {dimension_semantics = [#tpu.dimension_semantics<arbitrary>], iteration_bounds = array<i64: 1>, scalar_prefetch = 0 : i64, scratch_operands = 0 : i64, tpu.core_type = #tpu.core_type<tc>, window_params = [{pipeline_mode = #tpu.pipeline_mode<synchronous>, transform_indices = @transform_0, window_bounds = array<i64: 8, 8, 32>}, {pipeline_mode = #tpu.pipeline_mode<synchronous>, transform_indices = @transform_1, window_bounds = array<i64: 64, 128>}, {pipeline_mode = #tpu.pipeline_mode<synchronous>, transform_indices = @transform_2, window_bounds = array<i64: 1, 128>}, {pipeline_mode = #tpu.pipeline_mode<synchronous>, transform_indices = @transform_3, window_bounds = array<i64: 64, 128>}, {pipeline_mode = #tpu.pipeline_mode<synchronous>, transform_indices = @transform_4, window_bounds = array<i64: 1, 128>}, {pipeline_mode = #tpu.pipeline_mode<synchronous>, transform_indices = @transform_5, window_bounds = array<i64: 64, 32>}, {pipeline_mode = #tpu.pipeline_mode<synchronous>, transform_indices = @transform_6, window_bounds = array<i64: 1, 32>}, {pipeline_mode = #tpu.pipeline_mode<synchronous>, transform_indices = @transform_7, window_bounds = array<i64: 64, 32>}, {pipeline_mode = #tpu.pipeline_mode<synchronous>, transform_indices = @transform_8, window_bounds = array<i64: 1, 32>}, {pipeline_mode = #tpu.pipeline_mode<synchronous>, transform_indices = @transform_9, window_bounds = array<i64: 8, 8, 64>}, {pipeline_mode = #tpu.pipeline_mode<synchronous>, transform_indices = @transform_10, window_bounds = array<i64: 8, 64>}]} {
    %cst = arith.constant 0.000000e+00 : f32
    %0 = vector.broadcast %cst : f32 to vector<8x32xf32>
    %c0 = arith.constant 0 : index
    %c0_0 = arith.constant 0 : index
    %1 = vector.load %arg2[%c0, %c0_0] : memref<64x128xf32, #tpu.memory_space<vmem>>, vector<64x128xf32>
    %c0_1 = arith.constant 0 : index
    %c0_2 = arith.constant 0 : index
    %2 = vector.load %arg3[%c0_1, %c0_2] : memref<1x128xf32, #tpu.memory_space<vmem>>, vector<1x128xf32>
    %c0_3 = arith.constant 0 : index
    %c0_4 = arith.constant 0 : index
    %3 = vector.load %arg4[%c0_3, %c0_4] : memref<64x128xf32, #tpu.memory_space<vmem>>, vector<64x128xf32>
    %c0_5 = arith.constant 0 : index
    %c0_6 = arith.constant 0 : index
    %4 = vector.load %arg5[%c0_5, %c0_6] : memref<1x128xf32, #tpu.memory_space<vmem>>, vector<1x128xf32>
    %c0_7 = arith.constant 0 : index
    %c0_8 = arith.constant 0 : index
    %c0_9 = arith.constant 0 : index
    %5 = vector.load %arg1[%c0_7, %c0_8, %c0_9] : memref<8x8x32xf32, #tpu.memory_space<vmem>>, vector<1x8x32xf32>
    %6 = vector.shape_cast %5 : vector<1x8x32xf32> to vector<8x32xf32>
    %7 = tpu.concatenate %6, %0 in 1 : vector<8x32xf32>, vector<8x32xf32> -> vector<8x64xf32>
    %cst_10 = arith.constant dense<0.000000e+00> : vector<8x128xf32>
    %8 = tpu.matmul %7, %1, %cst_10 {dimension_numbers = #tpu.dot_dimension_numbers<[1], [0], [0], [1], [0, 0, 1, 1], [], []>} : vector<8x64xf32>, vector<64x128xf32>, vector<8x128xf32> -> vector<8x128xf32>
    %9 = vector.broadcast %2 : vector<1x128xf32> to vector<8x128xf32>
    %10 = arith.addf %8, %9 : vector<8x128xf32>
    %11 = vector.extract_strided_slice %10 {offsets = [0, 0], sizes = [8, 32], strides = [1, 1]} : vector<8x128xf32> to vector<8x32xf32>
    %12 = arith.negf %11 : vector<8x32xf32>
    %13 = math.exp %12 : vector<8x32xf32>
    %cst_11 = arith.constant 1.000000e+00 : f32
    %14 = vector.broadcast %cst_11 : f32 to vector<8x32xf32>
    %15 = arith.addf %14, %13 : vector<8x32xf32>
    %16 = arith.divf %14, %15 : vector<8x32xf32>
    %17 = vector.extract_strided_slice %10 {offsets = [0, 32], sizes = [8, 32], strides = [1, 1]} : vector<8x128xf32> to vector<8x32xf32>
    %18 = arith.negf %17 : vector<8x32xf32>
    %19 = math.exp %18 : vector<8x32xf32>
    %cst_12 = arith.constant 1.000000e+00 : f32
    %20 = vector.broadcast %cst_12 : f32 to vector<8x32xf32>
    %21 = arith.addf %20, %19 : vector<8x32xf32>
    %22 = arith.divf %20, %21 : vector<8x32xf32>
    %23 = vector.extract_strided_slice %10 {offsets = [0, 64], sizes = [8, 32], strides = [1, 1]} : vector<8x128xf32> to vector<8x32xf32>
    %24 = math.tanh %23 : vector<8x32xf32>
    %25 = vector.extract_strided_slice %10 {offsets = [0, 96], sizes = [8, 32], strides = [1, 1]} : vector<8x128xf32> to vector<8x32xf32>
    %26 = arith.negf %25 : vector<8x32xf32>
    %27 = math.exp %26 : vector<8x32xf32>
    %cst_13 = arith.constant 1.000000e+00 : f32
    %28 = vector.broadcast %cst_13 : f32 to vector<8x32xf32>
    %29 = arith.addf %28, %27 : vector<8x32xf32>
    %30 = arith.divf %28, %29 : vector<8x32xf32>
    %31 = arith.mulf %22, %0 : vector<8x32xf32>
    %32 = arith.mulf %16, %24 : vector<8x32xf32>
    %33 = arith.addf %31, %32 : vector<8x32xf32>
    %34 = math.tanh %33 : vector<8x32xf32>
    %35 = arith.mulf %30, %34 : vector<8x32xf32>
    %c7 = arith.constant 7 : index
    %c0_14 = arith.constant 0 : index
    %c0_15 = arith.constant 0 : index
    %36 = vector.load %arg1[%c7, %c0_14, %c0_15] : memref<8x8x32xf32, #tpu.memory_space<vmem>>, vector<1x8x32xf32>
    %37 = vector.shape_cast %36 : vector<1x8x32xf32> to vector<8x32xf32>
    %38 = tpu.concatenate %37, %0 in 1 : vector<8x32xf32>, vector<8x32xf32> -> vector<8x64xf32>
    %cst_16 = arith.constant dense<0.000000e+00> : vector<8x128xf32>
    %39 = tpu.matmul %38, %3, %cst_16 {dimension_numbers = #tpu.dot_dimension_numbers<[1], [0], [0], [1], [0, 0, 1, 1], [], []>} : vector<8x64xf32>, vector<64x128xf32>, vector<8x128xf32> -> vector<8x128xf32>
    %40 = vector.broadcast %4 : vector<1x128xf32> to vector<8x128xf32>
    %41 = arith.addf %39, %40 : vector<8x128xf32>
    %42 = vector.extract_strided_slice %41 {offsets = [0, 0], sizes = [8, 32], strides = [1, 1]} : vector<8x128xf32> to vector<8x32xf32>
    %43 = arith.negf %42 : vector<8x32xf32>
    %44 = math.exp %43 : vector<8x32xf32>
    %cst_17 = arith.constant 1.000000e+00 : f32
    %45 = vector.broadcast %cst_17 : f32 to vector<8x32xf32>
    %46 = arith.addf %45, %44 : vector<8x32xf32>
    %47 = arith.divf %45, %46 : vector<8x32xf32>
    %48 = vector.extract_strided_slice %41 {offsets = [0, 32], sizes = [8, 32], strides = [1, 1]} : vector<8x128xf32> to vector<8x32xf32>
    %49 = arith.negf %48 : vector<8x32xf32>
    %50 = math.exp %49 : vector<8x32xf32>
    %cst_18 = arith.constant 1.000000e+00 : f32
    %51 = vector.broadcast %cst_18 : f32 to vector<8x32xf32>
    %52 = arith.addf %51, %50 : vector<8x32xf32>
    %53 = arith.divf %51, %52 : vector<8x32xf32>
    %54 = vector.extract_strided_slice %41 {offsets = [0, 64], sizes = [8, 32], strides = [1, 1]} : vector<8x128xf32> to vector<8x32xf32>
    %55 = math.tanh %54 : vector<8x32xf32>
    %56 = vector.extract_strided_slice %41 {offsets = [0, 96], sizes = [8, 32], strides = [1, 1]} : vector<8x128xf32> to vector<8x32xf32>
    %57 = arith.negf %56 : vector<8x32xf32>
    %58 = math.exp %57 : vector<8x32xf32>
    %cst_19 = arith.constant 1.000000e+00 : f32
    %59 = vector.broadcast %cst_19 : f32 to vector<8x32xf32>
    %60 = arith.addf %59, %58 : vector<8x32xf32>
    %61 = arith.divf %59, %60 : vector<8x32xf32>
    %62 = arith.mulf %53, %0 : vector<8x32xf32>
    %63 = arith.mulf %47, %55 : vector<8x32xf32>
    %64 = arith.addf %62, %63 : vector<8x32xf32>
    %65 = math.tanh %64 : vector<8x32xf32>
    %66 = arith.mulf %61, %65 : vector<8x32xf32>
    %c1 = arith.constant 1 : index
    %c0_20 = arith.constant 0 : index
    %c0_21 = arith.constant 0 : index
    %67 = vector.load %arg1[%c1, %c0_20, %c0_21] : memref<8x8x32xf32, #tpu.memory_space<vmem>>, vector<1x8x32xf32>
    %68 = vector.shape_cast %67 : vector<1x8x32xf32> to vector<8x32xf32>
    %69 = tpu.concatenate %68, %35 in 1 : vector<8x32xf32>, vector<8x32xf32> -> vector<8x64xf32>
    %cst_22 = arith.constant dense<0.000000e+00> : vector<8x128xf32>
    %70 = tpu.matmul %69, %1, %cst_22 {dimension_numbers = #tpu.dot_dimension_numbers<[1], [0], [0], [1], [0, 0, 1, 1], [], []>} : vector<8x64xf32>, vector<64x128xf32>, vector<8x128xf32> -> vector<8x128xf32>
    %71 = vector.broadcast %2 : vector<1x128xf32> to vector<8x128xf32>
    %72 = arith.addf %70, %71 : vector<8x128xf32>
    %73 = vector.extract_strided_slice %72 {offsets = [0, 0], sizes = [8, 32], strides = [1, 1]} : vector<8x128xf32> to vector<8x32xf32>
    %74 = arith.negf %73 : vector<8x32xf32>
    %75 = math.exp %74 : vector<8x32xf32>
    %cst_23 = arith.constant 1.000000e+00 : f32
    %76 = vector.broadcast %cst_23 : f32 to vector<8x32xf32>
    %77 = arith.addf %76, %75 : vector<8x32xf32>
    %78 = arith.divf %76, %77 : vector<8x32xf32>
    %79 = vector.extract_strided_slice %72 {offsets = [0, 32], sizes = [8, 32], strides = [1, 1]} : vector<8x128xf32> to vector<8x32xf32>
    %80 = arith.negf %79 : vector<8x32xf32>
    %81 = math.exp %80 : vector<8x32xf32>
    %cst_24 = arith.constant 1.000000e+00 : f32
    %82 = vector.broadcast %cst_24 : f32 to vector<8x32xf32>
    %83 = arith.addf %82, %81 : vector<8x32xf32>
    %84 = arith.divf %82, %83 : vector<8x32xf32>
    %85 = vector.extract_strided_slice %72 {offsets = [0, 64], sizes = [8, 32], strides = [1, 1]} : vector<8x128xf32> to vector<8x32xf32>
    %86 = math.tanh %85 : vector<8x32xf32>
    %87 = vector.extract_strided_slice %72 {offsets = [0, 96], sizes = [8, 32], strides = [1, 1]} : vector<8x128xf32> to vector<8x32xf32>
    %88 = arith.negf %87 : vector<8x32xf32>
    %89 = math.exp %88 : vector<8x32xf32>
    %cst_25 = arith.constant 1.000000e+00 : f32
    %90 = vector.broadcast %cst_25 : f32 to vector<8x32xf32>
    %91 = arith.addf %90, %89 : vector<8x32xf32>
    %92 = arith.divf %90, %91 : vector<8x32xf32>
    %93 = arith.mulf %84, %33 : vector<8x32xf32>
    %94 = arith.mulf %78, %86 : vector<8x32xf32>
    %95 = arith.addf %93, %94 : vector<8x32xf32>
    %96 = math.tanh %95 : vector<8x32xf32>
    %97 = arith.mulf %92, %96 : vector<8x32xf32>
    %c6 = arith.constant 6 : index
    %c0_26 = arith.constant 0 : index
    %c0_27 = arith.constant 0 : index
    %98 = vector.load %arg1[%c6, %c0_26, %c0_27] : memref<8x8x32xf32, #tpu.memory_space<vmem>>, vector<1x8x32xf32>
    %99 = vector.shape_cast %98 : vector<1x8x32xf32> to vector<8x32xf32>
    %100 = tpu.concatenate %99, %66 in 1 : vector<8x32xf32>, vector<8x32xf32> -> vector<8x64xf32>
    %cst_28 = arith.constant dense<0.000000e+00> : vector<8x128xf32>
    %101 = tpu.matmul %100, %3, %cst_28 {dimension_numbers = #tpu.dot_dimension_numbers<[1], [0], [0], [1], [0, 0, 1, 1], [], []>} : vector<8x64xf32>, vector<64x128xf32>, vector<8x128xf32> -> vector<8x128xf32>
    %102 = vector.broadcast %4 : vector<1x128xf32> to vector<8x128xf32>
    %103 = arith.addf %101, %102 : vector<8x128xf32>
    %104 = vector.extract_strided_slice %103 {offsets = [0, 0], sizes = [8, 32], strides = [1, 1]} : vector<8x128xf32> to vector<8x32xf32>
    %105 = arith.negf %104 : vector<8x32xf32>
    %106 = math.exp %105 : vector<8x32xf32>
    %cst_29 = arith.constant 1.000000e+00 : f32
    %107 = vector.broadcast %cst_29 : f32 to vector<8x32xf32>
    %108 = arith.addf %107, %106 : vector<8x32xf32>
    %109 = arith.divf %107, %108 : vector<8x32xf32>
    %110 = vector.extract_strided_slice %103 {offsets = [0, 32], sizes = [8, 32], strides = [1, 1]} : vector<8x128xf32> to vector<8x32xf32>
    %111 = arith.negf %110 : vector<8x32xf32>
    %112 = math.exp %111 : vector<8x32xf32>
    %cst_30 = arith.constant 1.000000e+00 : f32
    %113 = vector.broadcast %cst_30 : f32 to vector<8x32xf32>
    %114 = arith.addf %113, %112 : vector<8x32xf32>
    %115 = arith.divf %113, %114 : vector<8x32xf32>
    %116 = vector.extract_strided_slice %103 {offsets = [0, 64], sizes = [8, 32], strides = [1, 1]} : vector<8x128xf32> to vector<8x32xf32>
    %117 = math.tanh %116 : vector<8x32xf32>
    %118 = vector.extract_strided_slice %103 {offsets = [0, 96], sizes = [8, 32], strides = [1, 1]} : vector<8x128xf32> to vector<8x32xf32>
    %119 = arith.negf %118 : vector<8x32xf32>
    %120 = math.exp %119 : vector<8x32xf32>
    %cst_31 = arith.constant 1.000000e+00 : f32
    %121 = vector.broadcast %cst_31 : f32 to vector<8x32xf32>
    %122 = arith.addf %121, %120 : vector<8x32xf32>
    %123 = arith.divf %121, %122 : vector<8x32xf32>
    %124 = arith.mulf %115, %64 : vector<8x32xf32>
    %125 = arith.mulf %109, %117 : vector<8x32xf32>
    %126 = arith.addf %124, %125 : vector<8x32xf32>
    %127 = math.tanh %126 : vector<8x32xf32>
    %128 = arith.mulf %123, %127 : vector<8x32xf32>
    %c2 = arith.constant 2 : index
    %c0_32 = arith.constant 0 : index
    %c0_33 = arith.constant 0 : index
    %129 = vector.load %arg1[%c2, %c0_32, %c0_33] : memref<8x8x32xf32, #tpu.memory_space<vmem>>, vector<1x8x32xf32>
    %130 = vector.shape_cast %129 : vector<1x8x32xf32> to vector<8x32xf32>
    %131 = tpu.concatenate %130, %97 in 1 : vector<8x32xf32>, vector<8x32xf32> -> vector<8x64xf32>
    %cst_34 = arith.constant dense<0.000000e+00> : vector<8x128xf32>
    %132 = tpu.matmul %131, %1, %cst_34 {dimension_numbers = #tpu.dot_dimension_numbers<[1], [0], [0], [1], [0, 0, 1, 1], [], []>} : vector<8x64xf32>, vector<64x128xf32>, vector<8x128xf32> -> vector<8x128xf32>
    %133 = vector.broadcast %2 : vector<1x128xf32> to vector<8x128xf32>
    %134 = arith.addf %132, %133 : vector<8x128xf32>
    %135 = vector.extract_strided_slice %134 {offsets = [0, 0], sizes = [8, 32], strides = [1, 1]} : vector<8x128xf32> to vector<8x32xf32>
    %136 = arith.negf %135 : vector<8x32xf32>
    %137 = math.exp %136 : vector<8x32xf32>
    %cst_35 = arith.constant 1.000000e+00 : f32
    %138 = vector.broadcast %cst_35 : f32 to vector<8x32xf32>
    %139 = arith.addf %138, %137 : vector<8x32xf32>
    %140 = arith.divf %138, %139 : vector<8x32xf32>
    %141 = vector.extract_strided_slice %134 {offsets = [0, 32], sizes = [8, 32], strides = [1, 1]} : vector<8x128xf32> to vector<8x32xf32>
    %142 = arith.negf %141 : vector<8x32xf32>
    %143 = math.exp %142 : vector<8x32xf32>
    %cst_36 = arith.constant 1.000000e+00 : f32
    %144 = vector.broadcast %cst_36 : f32 to vector<8x32xf32>
    %145 = arith.addf %144, %143 : vector<8x32xf32>
    %146 = arith.divf %144, %145 : vector<8x32xf32>
    %147 = vector.extract_strided_slice %134 {offsets = [0, 64], sizes = [8, 32], strides = [1, 1]} : vector<8x128xf32> to vector<8x32xf32>
    %148 = math.tanh %147 : vector<8x32xf32>
    %149 = vector.extract_strided_slice %134 {offsets = [0, 96], sizes = [8, 32], strides = [1, 1]} : vector<8x128xf32> to vector<8x32xf32>
    %150 = arith.negf %149 : vector<8x32xf32>
    %151 = math.exp %150 : vector<8x32xf32>
    %cst_37 = arith.constant 1.000000e+00 : f32
    %152 = vector.broadcast %cst_37 : f32 to vector<8x32xf32>
    %153 = arith.addf %152, %151 : vector<8x32xf32>
    %154 = arith.divf %152, %153 : vector<8x32xf32>
    %155 = arith.mulf %146, %95 : vector<8x32xf32>
    %156 = arith.mulf %140, %148 : vector<8x32xf32>
    %157 = arith.addf %155, %156 : vector<8x32xf32>
    %158 = math.tanh %157 : vector<8x32xf32>
    %159 = arith.mulf %154, %158 : vector<8x32xf32>
    %c5 = arith.constant 5 : index
    %c0_38 = arith.constant 0 : index
    %c0_39 = arith.constant 0 : index
    %160 = vector.load %arg1[%c5, %c0_38, %c0_39] : memref<8x8x32xf32, #tpu.memory_space<vmem>>, vector<1x8x32xf32>
    %161 = vector.shape_cast %160 : vector<1x8x32xf32> to vector<8x32xf32>
    %162 = tpu.concatenate %161, %128 in 1 : vector<8x32xf32>, vector<8x32xf32> -> vector<8x64xf32>
    %cst_40 = arith.constant dense<0.000000e+00> : vector<8x128xf32>
    %163 = tpu.matmul %162, %3, %cst_40 {dimension_numbers = #tpu.dot_dimension_numbers<[1], [0], [0], [1], [0, 0, 1, 1], [], []>} : vector<8x64xf32>, vector<64x128xf32>, vector<8x128xf32> -> vector<8x128xf32>
    %164 = vector.broadcast %4 : vector<1x128xf32> to vector<8x128xf32>
    %165 = arith.addf %163, %164 : vector<8x128xf32>
    %166 = vector.extract_strided_slice %165 {offsets = [0, 0], sizes = [8, 32], strides = [1, 1]} : vector<8x128xf32> to vector<8x32xf32>
    %167 = arith.negf %166 : vector<8x32xf32>
    %168 = math.exp %167 : vector<8x32xf32>
    %cst_41 = arith.constant 1.000000e+00 : f32
    %169 = vector.broadcast %cst_41 : f32 to vector<8x32xf32>
    %170 = arith.addf %169, %168 : vector<8x32xf32>
    %171 = arith.divf %169, %170 : vector<8x32xf32>
    %172 = vector.extract_strided_slice %165 {offsets = [0, 32], sizes = [8, 32], strides = [1, 1]} : vector<8x128xf32> to vector<8x32xf32>
    %173 = arith.negf %172 : vector<8x32xf32>
    %174 = math.exp %173 : vector<8x32xf32>
    %cst_42 = arith.constant 1.000000e+00 : f32
    %175 = vector.broadcast %cst_42 : f32 to vector<8x32xf32>
    %176 = arith.addf %175, %174 : vector<8x32xf32>
    %177 = arith.divf %175, %176 : vector<8x32xf32>
    %178 = vector.extract_strided_slice %165 {offsets = [0, 64], sizes = [8, 32], strides = [1, 1]} : vector<8x128xf32> to vector<8x32xf32>
    %179 = math.tanh %178 : vector<8x32xf32>
    %180 = vector.extract_strided_slice %165 {offsets = [0, 96], sizes = [8, 32], strides = [1, 1]} : vector<8x128xf32> to vector<8x32xf32>
    %181 = arith.negf %180 : vector<8x32xf32>
    %182 = math.exp %181 : vector<8x32xf32>
    %cst_43 = arith.constant 1.000000e+00 : f32
    %183 = vector.broadcast %cst_43 : f32 to vector<8x32xf32>
    %184 = arith.addf %183, %182 : vector<8x32xf32>
    %185 = arith.divf %183, %184 : vector<8x32xf32>
    %186 = arith.mulf %177, %126 : vector<8x32xf32>
    %187 = arith.mulf %171, %179 : vector<8x32xf32>
    %188 = arith.addf %186, %187 : vector<8x32xf32>
    %189 = math.tanh %188 : vector<8x32xf32>
    %190 = arith.mulf %185, %189 : vector<8x32xf32>
    %c3 = arith.constant 3 : index
    %c0_44 = arith.constant 0 : index
    %c0_45 = arith.constant 0 : index
    %191 = vector.load %arg1[%c3, %c0_44, %c0_45] : memref<8x8x32xf32, #tpu.memory_space<vmem>>, vector<1x8x32xf32>
    %192 = vector.shape_cast %191 : vector<1x8x32xf32> to vector<8x32xf32>
    %193 = tpu.concatenate %192, %159 in 1 : vector<8x32xf32>, vector<8x32xf32> -> vector<8x64xf32>
    %cst_46 = arith.constant dense<0.000000e+00> : vector<8x128xf32>
    %194 = tpu.matmul %193, %1, %cst_46 {dimension_numbers = #tpu.dot_dimension_numbers<[1], [0], [0], [1], [0, 0, 1, 1], [], []>} : vector<8x64xf32>, vector<64x128xf32>, vector<8x128xf32> -> vector<8x128xf32>
    %195 = vector.broadcast %2 : vector<1x128xf32> to vector<8x128xf32>
    %196 = arith.addf %194, %195 : vector<8x128xf32>
    %197 = vector.extract_strided_slice %196 {offsets = [0, 0], sizes = [8, 32], strides = [1, 1]} : vector<8x128xf32> to vector<8x32xf32>
    %198 = arith.negf %197 : vector<8x32xf32>
    %199 = math.exp %198 : vector<8x32xf32>
    %cst_47 = arith.constant 1.000000e+00 : f32
    %200 = vector.broadcast %cst_47 : f32 to vector<8x32xf32>
    %201 = arith.addf %200, %199 : vector<8x32xf32>
    %202 = arith.divf %200, %201 : vector<8x32xf32>
    %203 = vector.extract_strided_slice %196 {offsets = [0, 32], sizes = [8, 32], strides = [1, 1]} : vector<8x128xf32> to vector<8x32xf32>
    %204 = arith.negf %203 : vector<8x32xf32>
    %205 = math.exp %204 : vector<8x32xf32>
    %cst_48 = arith.constant 1.000000e+00 : f32
    %206 = vector.broadcast %cst_48 : f32 to vector<8x32xf32>
    %207 = arith.addf %206, %205 : vector<8x32xf32>
    %208 = arith.divf %206, %207 : vector<8x32xf32>
    %209 = vector.extract_strided_slice %196 {offsets = [0, 64], sizes = [8, 32], strides = [1, 1]} : vector<8x128xf32> to vector<8x32xf32>
    %210 = math.tanh %209 : vector<8x32xf32>
    %211 = vector.extract_strided_slice %196 {offsets = [0, 96], sizes = [8, 32], strides = [1, 1]} : vector<8x128xf32> to vector<8x32xf32>
    %212 = arith.negf %211 : vector<8x32xf32>
    %213 = math.exp %212 : vector<8x32xf32>
    %cst_49 = arith.constant 1.000000e+00 : f32
    %214 = vector.broadcast %cst_49 : f32 to vector<8x32xf32>
    %215 = arith.addf %214, %213 : vector<8x32xf32>
    %216 = arith.divf %214, %215 : vector<8x32xf32>
    %217 = arith.mulf %208, %157 : vector<8x32xf32>
    %218 = arith.mulf %202, %210 : vector<8x32xf32>
    %219 = arith.addf %217, %218 : vector<8x32xf32>
    %220 = math.tanh %219 : vector<8x32xf32>
    %221 = arith.mulf %216, %220 : vector<8x32xf32>
    %c4 = arith.constant 4 : index
    %c0_50 = arith.constant 0 : index
    %c0_51 = arith.constant 0 : index
    %222 = vector.load %arg1[%c4, %c0_50, %c0_51] : memref<8x8x32xf32, #tpu.memory_space<vmem>>, vector<1x8x32xf32>
    %223 = vector.shape_cast %222 : vector<1x8x32xf32> to vector<8x32xf32>
    %224 = tpu.concatenate %223, %190 in 1 : vector<8x32xf32>, vector<8x32xf32> -> vector<8x64xf32>
    %cst_52 = arith.constant dense<0.000000e+00> : vector<8x128xf32>
    %225 = tpu.matmul %224, %3, %cst_52 {dimension_numbers = #tpu.dot_dimension_numbers<[1], [0], [0], [1], [0, 0, 1, 1], [], []>} : vector<8x64xf32>, vector<64x128xf32>, vector<8x128xf32> -> vector<8x128xf32>
    %226 = vector.broadcast %4 : vector<1x128xf32> to vector<8x128xf32>
    %227 = arith.addf %225, %226 : vector<8x128xf32>
    %228 = vector.extract_strided_slice %227 {offsets = [0, 0], sizes = [8, 32], strides = [1, 1]} : vector<8x128xf32> to vector<8x32xf32>
    %229 = arith.negf %228 : vector<8x32xf32>
    %230 = math.exp %229 : vector<8x32xf32>
    %cst_53 = arith.constant 1.000000e+00 : f32
    %231 = vector.broadcast %cst_53 : f32 to vector<8x32xf32>
    %232 = arith.addf %231, %230 : vector<8x32xf32>
    %233 = arith.divf %231, %232 : vector<8x32xf32>
    %234 = vector.extract_strided_slice %227 {offsets = [0, 32], sizes = [8, 32], strides = [1, 1]} : vector<8x128xf32> to vector<8x32xf32>
    %235 = arith.negf %234 : vector<8x32xf32>
    %236 = math.exp %235 : vector<8x32xf32>
    %cst_54 = arith.constant 1.000000e+00 : f32
    %237 = vector.broadcast %cst_54 : f32 to vector<8x32xf32>
    %238 = arith.addf %237, %236 : vector<8x32xf32>
    %239 = arith.divf %237, %238 : vector<8x32xf32>
    %240 = vector.extract_strided_slice %227 {offsets = [0, 64], sizes = [8, 32], strides = [1, 1]} : vector<8x128xf32> to vector<8x32xf32>
    %241 = math.tanh %240 : vector<8x32xf32>
    %242 = vector.extract_strided_slice %227 {offsets = [0, 96], sizes = [8, 32], strides = [1, 1]} : vector<8x128xf32> to vector<8x32xf32>
    %243 = arith.negf %242 : vector<8x32xf32>
    %244 = math.exp %243 : vector<8x32xf32>
    %cst_55 = arith.constant 1.000000e+00 : f32
    %245 = vector.broadcast %cst_55 : f32 to vector<8x32xf32>
    %246 = arith.addf %245, %244 : vector<8x32xf32>
    %247 = arith.divf %245, %246 : vector<8x32xf32>
    %248 = arith.mulf %239, %188 : vector<8x32xf32>
    %249 = arith.mulf %233, %241 : vector<8x32xf32>
    %250 = arith.addf %248, %249 : vector<8x32xf32>
    %251 = math.tanh %250 : vector<8x32xf32>
    %252 = arith.mulf %247, %251 : vector<8x32xf32>
    %c4_56 = arith.constant 4 : index
    %c0_57 = arith.constant 0 : index
    %c0_58 = arith.constant 0 : index
    %253 = vector.load %arg1[%c4_56, %c0_57, %c0_58] : memref<8x8x32xf32, #tpu.memory_space<vmem>>, vector<1x8x32xf32>
    %254 = vector.shape_cast %253 : vector<1x8x32xf32> to vector<8x32xf32>
    %255 = tpu.concatenate %254, %221 in 1 : vector<8x32xf32>, vector<8x32xf32> -> vector<8x64xf32>
    %cst_59 = arith.constant dense<0.000000e+00> : vector<8x128xf32>
    %256 = tpu.matmul %255, %1, %cst_59 {dimension_numbers = #tpu.dot_dimension_numbers<[1], [0], [0], [1], [0, 0, 1, 1], [], []>} : vector<8x64xf32>, vector<64x128xf32>, vector<8x128xf32> -> vector<8x128xf32>
    %257 = vector.broadcast %2 : vector<1x128xf32> to vector<8x128xf32>
    %258 = arith.addf %256, %257 : vector<8x128xf32>
    %259 = vector.extract_strided_slice %258 {offsets = [0, 0], sizes = [8, 32], strides = [1, 1]} : vector<8x128xf32> to vector<8x32xf32>
    %260 = arith.negf %259 : vector<8x32xf32>
    %261 = math.exp %260 : vector<8x32xf32>
    %cst_60 = arith.constant 1.000000e+00 : f32
    %262 = vector.broadcast %cst_60 : f32 to vector<8x32xf32>
    %263 = arith.addf %262, %261 : vector<8x32xf32>
    %264 = arith.divf %262, %263 : vector<8x32xf32>
    %265 = vector.extract_strided_slice %258 {offsets = [0, 32], sizes = [8, 32], strides = [1, 1]} : vector<8x128xf32> to vector<8x32xf32>
    %266 = arith.negf %265 : vector<8x32xf32>
    %267 = math.exp %266 : vector<8x32xf32>
    %cst_61 = arith.constant 1.000000e+00 : f32
    %268 = vector.broadcast %cst_61 : f32 to vector<8x32xf32>
    %269 = arith.addf %268, %267 : vector<8x32xf32>
    %270 = arith.divf %268, %269 : vector<8x32xf32>
    %271 = vector.extract_strided_slice %258 {offsets = [0, 64], sizes = [8, 32], strides = [1, 1]} : vector<8x128xf32> to vector<8x32xf32>
    %272 = math.tanh %271 : vector<8x32xf32>
    %273 = vector.extract_strided_slice %258 {offsets = [0, 96], sizes = [8, 32], strides = [1, 1]} : vector<8x128xf32> to vector<8x32xf32>
    %274 = arith.negf %273 : vector<8x32xf32>
    %275 = math.exp %274 : vector<8x32xf32>
    %cst_62 = arith.constant 1.000000e+00 : f32
    %276 = vector.broadcast %cst_62 : f32 to vector<8x32xf32>
    %277 = arith.addf %276, %275 : vector<8x32xf32>
    %278 = arith.divf %276, %277 : vector<8x32xf32>
    %279 = arith.mulf %270, %219 : vector<8x32xf32>
    %280 = arith.mulf %264, %272 : vector<8x32xf32>
    %281 = arith.addf %279, %280 : vector<8x32xf32>
    %282 = math.tanh %281 : vector<8x32xf32>
    %283 = arith.mulf %278, %282 : vector<8x32xf32>
    %c3_63 = arith.constant 3 : index
    %c0_64 = arith.constant 0 : index
    %c0_65 = arith.constant 0 : index
    %284 = vector.load %arg1[%c3_63, %c0_64, %c0_65] : memref<8x8x32xf32, #tpu.memory_space<vmem>>, vector<1x8x32xf32>
    %285 = vector.shape_cast %284 : vector<1x8x32xf32> to vector<8x32xf32>
    %286 = tpu.concatenate %285, %252 in 1 : vector<8x32xf32>, vector<8x32xf32> -> vector<8x64xf32>
    %cst_66 = arith.constant dense<0.000000e+00> : vector<8x128xf32>
    %287 = tpu.matmul %286, %3, %cst_66 {dimension_numbers = #tpu.dot_dimension_numbers<[1], [0], [0], [1], [0, 0, 1, 1], [], []>} : vector<8x64xf32>, vector<64x128xf32>, vector<8x128xf32> -> vector<8x128xf32>
    %288 = vector.broadcast %4 : vector<1x128xf32> to vector<8x128xf32>
    %289 = arith.addf %287, %288 : vector<8x128xf32>
    %290 = vector.extract_strided_slice %289 {offsets = [0, 0], sizes = [8, 32], strides = [1, 1]} : vector<8x128xf32> to vector<8x32xf32>
    %291 = arith.negf %290 : vector<8x32xf32>
    %292 = math.exp %291 : vector<8x32xf32>
    %cst_67 = arith.constant 1.000000e+00 : f32
    %293 = vector.broadcast %cst_67 : f32 to vector<8x32xf32>
    %294 = arith.addf %293, %292 : vector<8x32xf32>
    %295 = arith.divf %293, %294 : vector<8x32xf32>
    %296 = vector.extract_strided_slice %289 {offsets = [0, 32], sizes = [8, 32], strides = [1, 1]} : vector<8x128xf32> to vector<8x32xf32>
    %297 = arith.negf %296 : vector<8x32xf32>
    %298 = math.exp %297 : vector<8x32xf32>
    %cst_68 = arith.constant 1.000000e+00 : f32
    %299 = vector.broadcast %cst_68 : f32 to vector<8x32xf32>
    %300 = arith.addf %299, %298 : vector<8x32xf32>
    %301 = arith.divf %299, %300 : vector<8x32xf32>
    %302 = vector.extract_strided_slice %289 {offsets = [0, 64], sizes = [8, 32], strides = [1, 1]} : vector<8x128xf32> to vector<8x32xf32>
    %303 = math.tanh %302 : vector<8x32xf32>
    %304 = vector.extract_strided_slice %289 {offsets = [0, 96], sizes = [8, 32], strides = [1, 1]} : vector<8x128xf32> to vector<8x32xf32>
    %305 = arith.negf %304 : vector<8x32xf32>
    %306 = math.exp %305 : vector<8x32xf32>
    %cst_69 = arith.constant 1.000000e+00 : f32
    %307 = vector.broadcast %cst_69 : f32 to vector<8x32xf32>
    %308 = arith.addf %307, %306 : vector<8x32xf32>
    %309 = arith.divf %307, %308 : vector<8x32xf32>
    %310 = arith.mulf %301, %250 : vector<8x32xf32>
    %311 = arith.mulf %295, %303 : vector<8x32xf32>
    %312 = arith.addf %310, %311 : vector<8x32xf32>
    %313 = math.tanh %312 : vector<8x32xf32>
    %314 = arith.mulf %309, %313 : vector<8x32xf32>
    %c5_70 = arith.constant 5 : index
    %c0_71 = arith.constant 0 : index
    %c0_72 = arith.constant 0 : index
    %315 = vector.load %arg1[%c5_70, %c0_71, %c0_72] : memref<8x8x32xf32, #tpu.memory_space<vmem>>, vector<1x8x32xf32>
    %316 = vector.shape_cast %315 : vector<1x8x32xf32> to vector<8x32xf32>
    %317 = tpu.concatenate %316, %283 in 1 : vector<8x32xf32>, vector<8x32xf32> -> vector<8x64xf32>
    %cst_73 = arith.constant dense<0.000000e+00> : vector<8x128xf32>
    %318 = tpu.matmul %317, %1, %cst_73 {dimension_numbers = #tpu.dot_dimension_numbers<[1], [0], [0], [1], [0, 0, 1, 1], [], []>} : vector<8x64xf32>, vector<64x128xf32>, vector<8x128xf32> -> vector<8x128xf32>
    %319 = vector.broadcast %2 : vector<1x128xf32> to vector<8x128xf32>
    %320 = arith.addf %318, %319 : vector<8x128xf32>
    %321 = vector.extract_strided_slice %320 {offsets = [0, 0], sizes = [8, 32], strides = [1, 1]} : vector<8x128xf32> to vector<8x32xf32>
    %322 = arith.negf %321 : vector<8x32xf32>
    %323 = math.exp %322 : vector<8x32xf32>
    %cst_74 = arith.constant 1.000000e+00 : f32
    %324 = vector.broadcast %cst_74 : f32 to vector<8x32xf32>
    %325 = arith.addf %324, %323 : vector<8x32xf32>
    %326 = arith.divf %324, %325 : vector<8x32xf32>
    %327 = vector.extract_strided_slice %320 {offsets = [0, 32], sizes = [8, 32], strides = [1, 1]} : vector<8x128xf32> to vector<8x32xf32>
    %328 = arith.negf %327 : vector<8x32xf32>
    %329 = math.exp %328 : vector<8x32xf32>
    %cst_75 = arith.constant 1.000000e+00 : f32
    %330 = vector.broadcast %cst_75 : f32 to vector<8x32xf32>
    %331 = arith.addf %330, %329 : vector<8x32xf32>
    %332 = arith.divf %330, %331 : vector<8x32xf32>
    %333 = vector.extract_strided_slice %320 {offsets = [0, 64], sizes = [8, 32], strides = [1, 1]} : vector<8x128xf32> to vector<8x32xf32>
    %334 = math.tanh %333 : vector<8x32xf32>
    %335 = vector.extract_strided_slice %320 {offsets = [0, 96], sizes = [8, 32], strides = [1, 1]} : vector<8x128xf32> to vector<8x32xf32>
    %336 = arith.negf %335 : vector<8x32xf32>
    %337 = math.exp %336 : vector<8x32xf32>
    %cst_76 = arith.constant 1.000000e+00 : f32
    %338 = vector.broadcast %cst_76 : f32 to vector<8x32xf32>
    %339 = arith.addf %338, %337 : vector<8x32xf32>
    %340 = arith.divf %338, %339 : vector<8x32xf32>
    %341 = arith.mulf %332, %281 : vector<8x32xf32>
    %342 = arith.mulf %326, %334 : vector<8x32xf32>
    %343 = arith.addf %341, %342 : vector<8x32xf32>
    %344 = math.tanh %343 : vector<8x32xf32>
    %345 = arith.mulf %340, %344 : vector<8x32xf32>
    %c2_77 = arith.constant 2 : index
    %c0_78 = arith.constant 0 : index
    %c0_79 = arith.constant 0 : index
    %346 = vector.load %arg1[%c2_77, %c0_78, %c0_79] : memref<8x8x32xf32, #tpu.memory_space<vmem>>, vector<1x8x32xf32>
    %347 = vector.shape_cast %346 : vector<1x8x32xf32> to vector<8x32xf32>
    %348 = tpu.concatenate %347, %314 in 1 : vector<8x32xf32>, vector<8x32xf32> -> vector<8x64xf32>
    %cst_80 = arith.constant dense<0.000000e+00> : vector<8x128xf32>
    %349 = tpu.matmul %348, %3, %cst_80 {dimension_numbers = #tpu.dot_dimension_numbers<[1], [0], [0], [1], [0, 0, 1, 1], [], []>} : vector<8x64xf32>, vector<64x128xf32>, vector<8x128xf32> -> vector<8x128xf32>
    %350 = vector.broadcast %4 : vector<1x128xf32> to vector<8x128xf32>
    %351 = arith.addf %349, %350 : vector<8x128xf32>
    %352 = vector.extract_strided_slice %351 {offsets = [0, 0], sizes = [8, 32], strides = [1, 1]} : vector<8x128xf32> to vector<8x32xf32>
    %353 = arith.negf %352 : vector<8x32xf32>
    %354 = math.exp %353 : vector<8x32xf32>
    %cst_81 = arith.constant 1.000000e+00 : f32
    %355 = vector.broadcast %cst_81 : f32 to vector<8x32xf32>
    %356 = arith.addf %355, %354 : vector<8x32xf32>
    %357 = arith.divf %355, %356 : vector<8x32xf32>
    %358 = vector.extract_strided_slice %351 {offsets = [0, 32], sizes = [8, 32], strides = [1, 1]} : vector<8x128xf32> to vector<8x32xf32>
    %359 = arith.negf %358 : vector<8x32xf32>
    %360 = math.exp %359 : vector<8x32xf32>
    %cst_82 = arith.constant 1.000000e+00 : f32
    %361 = vector.broadcast %cst_82 : f32 to vector<8x32xf32>
    %362 = arith.addf %361, %360 : vector<8x32xf32>
    %363 = arith.divf %361, %362 : vector<8x32xf32>
    %364 = vector.extract_strided_slice %351 {offsets = [0, 64], sizes = [8, 32], strides = [1, 1]} : vector<8x128xf32> to vector<8x32xf32>
    %365 = math.tanh %364 : vector<8x32xf32>
    %366 = vector.extract_strided_slice %351 {offsets = [0, 96], sizes = [8, 32], strides = [1, 1]} : vector<8x128xf32> to vector<8x32xf32>
    %367 = arith.negf %366 : vector<8x32xf32>
    %368 = math.exp %367 : vector<8x32xf32>
    %cst_83 = arith.constant 1.000000e+00 : f32
    %369 = vector.broadcast %cst_83 : f32 to vector<8x32xf32>
    %370 = arith.addf %369, %368 : vector<8x32xf32>
    %371 = arith.divf %369, %370 : vector<8x32xf32>
    %372 = arith.mulf %363, %312 : vector<8x32xf32>
    %373 = arith.mulf %357, %365 : vector<8x32xf32>
    %374 = arith.addf %372, %373 : vector<8x32xf32>
    %375 = math.tanh %374 : vector<8x32xf32>
    %376 = arith.mulf %371, %375 : vector<8x32xf32>
    %c6_84 = arith.constant 6 : index
    %c0_85 = arith.constant 0 : index
    %c0_86 = arith.constant 0 : index
    %377 = vector.load %arg1[%c6_84, %c0_85, %c0_86] : memref<8x8x32xf32, #tpu.memory_space<vmem>>, vector<1x8x32xf32>
    %378 = vector.shape_cast %377 : vector<1x8x32xf32> to vector<8x32xf32>
    %379 = tpu.concatenate %378, %345 in 1 : vector<8x32xf32>, vector<8x32xf32> -> vector<8x64xf32>
    %cst_87 = arith.constant dense<0.000000e+00> : vector<8x128xf32>
    %380 = tpu.matmul %379, %1, %cst_87 {dimension_numbers = #tpu.dot_dimension_numbers<[1], [0], [0], [1], [0, 0, 1, 1], [], []>} : vector<8x64xf32>, vector<64x128xf32>, vector<8x128xf32> -> vector<8x128xf32>
    %381 = vector.broadcast %2 : vector<1x128xf32> to vector<8x128xf32>
    %382 = arith.addf %380, %381 : vector<8x128xf32>
    %383 = vector.extract_strided_slice %382 {offsets = [0, 0], sizes = [8, 32], strides = [1, 1]} : vector<8x128xf32> to vector<8x32xf32>
    %384 = arith.negf %383 : vector<8x32xf32>
    %385 = math.exp %384 : vector<8x32xf32>
    %cst_88 = arith.constant 1.000000e+00 : f32
    %386 = vector.broadcast %cst_88 : f32 to vector<8x32xf32>
    %387 = arith.addf %386, %385 : vector<8x32xf32>
    %388 = arith.divf %386, %387 : vector<8x32xf32>
    %389 = vector.extract_strided_slice %382 {offsets = [0, 32], sizes = [8, 32], strides = [1, 1]} : vector<8x128xf32> to vector<8x32xf32>
    %390 = arith.negf %389 : vector<8x32xf32>
    %391 = math.exp %390 : vector<8x32xf32>
    %cst_89 = arith.constant 1.000000e+00 : f32
    %392 = vector.broadcast %cst_89 : f32 to vector<8x32xf32>
    %393 = arith.addf %392, %391 : vector<8x32xf32>
    %394 = arith.divf %392, %393 : vector<8x32xf32>
    %395 = vector.extract_strided_slice %382 {offsets = [0, 64], sizes = [8, 32], strides = [1, 1]} : vector<8x128xf32> to vector<8x32xf32>
    %396 = math.tanh %395 : vector<8x32xf32>
    %397 = vector.extract_strided_slice %382 {offsets = [0, 96], sizes = [8, 32], strides = [1, 1]} : vector<8x128xf32> to vector<8x32xf32>
    %398 = arith.negf %397 : vector<8x32xf32>
    %399 = math.exp %398 : vector<8x32xf32>
    %cst_90 = arith.constant 1.000000e+00 : f32
    %400 = vector.broadcast %cst_90 : f32 to vector<8x32xf32>
    %401 = arith.addf %400, %399 : vector<8x32xf32>
    %402 = arith.divf %400, %401 : vector<8x32xf32>
    %403 = arith.mulf %394, %343 : vector<8x32xf32>
    %404 = arith.mulf %388, %396 : vector<8x32xf32>
    %405 = arith.addf %403, %404 : vector<8x32xf32>
    %406 = math.tanh %405 : vector<8x32xf32>
    %407 = arith.mulf %402, %406 : vector<8x32xf32>
    %c1_91 = arith.constant 1 : index
    %c0_92 = arith.constant 0 : index
    %c0_93 = arith.constant 0 : index
    %408 = vector.load %arg1[%c1_91, %c0_92, %c0_93] : memref<8x8x32xf32, #tpu.memory_space<vmem>>, vector<1x8x32xf32>
    %409 = vector.shape_cast %408 : vector<1x8x32xf32> to vector<8x32xf32>
    %410 = tpu.concatenate %409, %376 in 1 : vector<8x32xf32>, vector<8x32xf32> -> vector<8x64xf32>
    %cst_94 = arith.constant dense<0.000000e+00> : vector<8x128xf32>
    %411 = tpu.matmul %410, %3, %cst_94 {dimension_numbers = #tpu.dot_dimension_numbers<[1], [0], [0], [1], [0, 0, 1, 1], [], []>} : vector<8x64xf32>, vector<64x128xf32>, vector<8x128xf32> -> vector<8x128xf32>
    %412 = vector.broadcast %4 : vector<1x128xf32> to vector<8x128xf32>
    %413 = arith.addf %411, %412 : vector<8x128xf32>
    %414 = vector.extract_strided_slice %413 {offsets = [0, 0], sizes = [8, 32], strides = [1, 1]} : vector<8x128xf32> to vector<8x32xf32>
    %415 = arith.negf %414 : vector<8x32xf32>
    %416 = math.exp %415 : vector<8x32xf32>
    %cst_95 = arith.constant 1.000000e+00 : f32
    %417 = vector.broadcast %cst_95 : f32 to vector<8x32xf32>
    %418 = arith.addf %417, %416 : vector<8x32xf32>
    %419 = arith.divf %417, %418 : vector<8x32xf32>
    %420 = vector.extract_strided_slice %413 {offsets = [0, 32], sizes = [8, 32], strides = [1, 1]} : vector<8x128xf32> to vector<8x32xf32>
    %421 = arith.negf %420 : vector<8x32xf32>
    %422 = math.exp %421 : vector<8x32xf32>
    %cst_96 = arith.constant 1.000000e+00 : f32
    %423 = vector.broadcast %cst_96 : f32 to vector<8x32xf32>
    %424 = arith.addf %423, %422 : vector<8x32xf32>
    %425 = arith.divf %423, %424 : vector<8x32xf32>
    %426 = vector.extract_strided_slice %413 {offsets = [0, 64], sizes = [8, 32], strides = [1, 1]} : vector<8x128xf32> to vector<8x32xf32>
    %427 = math.tanh %426 : vector<8x32xf32>
    %428 = vector.extract_strided_slice %413 {offsets = [0, 96], sizes = [8, 32], strides = [1, 1]} : vector<8x128xf32> to vector<8x32xf32>
    %429 = arith.negf %428 : vector<8x32xf32>
    %430 = math.exp %429 : vector<8x32xf32>
    %cst_97 = arith.constant 1.000000e+00 : f32
    %431 = vector.broadcast %cst_97 : f32 to vector<8x32xf32>
    %432 = arith.addf %431, %430 : vector<8x32xf32>
    %433 = arith.divf %431, %432 : vector<8x32xf32>
    %434 = arith.mulf %425, %374 : vector<8x32xf32>
    %435 = arith.mulf %419, %427 : vector<8x32xf32>
    %436 = arith.addf %434, %435 : vector<8x32xf32>
    %437 = math.tanh %436 : vector<8x32xf32>
    %438 = arith.mulf %433, %437 : vector<8x32xf32>
    %c7_98 = arith.constant 7 : index
    %c0_99 = arith.constant 0 : index
    %c0_100 = arith.constant 0 : index
    %439 = vector.load %arg1[%c7_98, %c0_99, %c0_100] : memref<8x8x32xf32, #tpu.memory_space<vmem>>, vector<1x8x32xf32>
    %440 = vector.shape_cast %439 : vector<1x8x32xf32> to vector<8x32xf32>
    %441 = tpu.concatenate %440, %407 in 1 : vector<8x32xf32>, vector<8x32xf32> -> vector<8x64xf32>
    %cst_101 = arith.constant dense<0.000000e+00> : vector<8x128xf32>
    %442 = tpu.matmul %441, %1, %cst_101 {dimension_numbers = #tpu.dot_dimension_numbers<[1], [0], [0], [1], [0, 0, 1, 1], [], []>} : vector<8x64xf32>, vector<64x128xf32>, vector<8x128xf32> -> vector<8x128xf32>
    %443 = vector.broadcast %2 : vector<1x128xf32> to vector<8x128xf32>
    %444 = arith.addf %442, %443 : vector<8x128xf32>
    %445 = vector.extract_strided_slice %444 {offsets = [0, 0], sizes = [8, 32], strides = [1, 1]} : vector<8x128xf32> to vector<8x32xf32>
    %446 = arith.negf %445 : vector<8x32xf32>
    %447 = math.exp %446 : vector<8x32xf32>
    %cst_102 = arith.constant 1.000000e+00 : f32
    %448 = vector.broadcast %cst_102 : f32 to vector<8x32xf32>
    %449 = arith.addf %448, %447 : vector<8x32xf32>
    %450 = arith.divf %448, %449 : vector<8x32xf32>
    %451 = vector.extract_strided_slice %444 {offsets = [0, 32], sizes = [8, 32], strides = [1, 1]} : vector<8x128xf32> to vector<8x32xf32>
    %452 = arith.negf %451 : vector<8x32xf32>
    %453 = math.exp %452 : vector<8x32xf32>
    %cst_103 = arith.constant 1.000000e+00 : f32
    %454 = vector.broadcast %cst_103 : f32 to vector<8x32xf32>
    %455 = arith.addf %454, %453 : vector<8x32xf32>
    %456 = arith.divf %454, %455 : vector<8x32xf32>
    %457 = vector.extract_strided_slice %444 {offsets = [0, 64], sizes = [8, 32], strides = [1, 1]} : vector<8x128xf32> to vector<8x32xf32>
    %458 = math.tanh %457 : vector<8x32xf32>
    %459 = vector.extract_strided_slice %444 {offsets = [0, 96], sizes = [8, 32], strides = [1, 1]} : vector<8x128xf32> to vector<8x32xf32>
    %460 = arith.negf %459 : vector<8x32xf32>
    %461 = math.exp %460 : vector<8x32xf32>
    %cst_104 = arith.constant 1.000000e+00 : f32
    %462 = vector.broadcast %cst_104 : f32 to vector<8x32xf32>
    %463 = arith.addf %462, %461 : vector<8x32xf32>
    %464 = arith.divf %462, %463 : vector<8x32xf32>
    %465 = arith.mulf %456, %405 : vector<8x32xf32>
    %466 = arith.mulf %450, %458 : vector<8x32xf32>
    %467 = arith.addf %465, %466 : vector<8x32xf32>
    %468 = math.tanh %467 : vector<8x32xf32>
    %469 = arith.mulf %464, %468 : vector<8x32xf32>
    %c0_105 = arith.constant 0 : index
    %c0_106 = arith.constant 0 : index
    %c0_107 = arith.constant 0 : index
    %470 = vector.load %arg1[%c0_105, %c0_106, %c0_107] : memref<8x8x32xf32, #tpu.memory_space<vmem>>, vector<1x8x32xf32>
    %471 = vector.shape_cast %470 : vector<1x8x32xf32> to vector<8x32xf32>
    %472 = tpu.concatenate %471, %438 in 1 : vector<8x32xf32>, vector<8x32xf32> -> vector<8x64xf32>
    %cst_108 = arith.constant dense<0.000000e+00> : vector<8x128xf32>
    %473 = tpu.matmul %472, %3, %cst_108 {dimension_numbers = #tpu.dot_dimension_numbers<[1], [0], [0], [1], [0, 0, 1, 1], [], []>} : vector<8x64xf32>, vector<64x128xf32>, vector<8x128xf32> -> vector<8x128xf32>
    %474 = vector.broadcast %4 : vector<1x128xf32> to vector<8x128xf32>
    %475 = arith.addf %473, %474 : vector<8x128xf32>
    %476 = vector.extract_strided_slice %475 {offsets = [0, 0], sizes = [8, 32], strides = [1, 1]} : vector<8x128xf32> to vector<8x32xf32>
    %477 = arith.negf %476 : vector<8x32xf32>
    %478 = math.exp %477 : vector<8x32xf32>
    %cst_109 = arith.constant 1.000000e+00 : f32
    %479 = vector.broadcast %cst_109 : f32 to vector<8x32xf32>
    %480 = arith.addf %479, %478 : vector<8x32xf32>
    %481 = arith.divf %479, %480 : vector<8x32xf32>
    %482 = vector.extract_strided_slice %475 {offsets = [0, 32], sizes = [8, 32], strides = [1, 1]} : vector<8x128xf32> to vector<8x32xf32>
    %483 = arith.negf %482 : vector<8x32xf32>
    %484 = math.exp %483 : vector<8x32xf32>
    %cst_110 = arith.constant 1.000000e+00 : f32
    %485 = vector.broadcast %cst_110 : f32 to vector<8x32xf32>
    %486 = arith.addf %485, %484 : vector<8x32xf32>
    %487 = arith.divf %485, %486 : vector<8x32xf32>
    %488 = vector.extract_strided_slice %475 {offsets = [0, 64], sizes = [8, 32], strides = [1, 1]} : vector<8x128xf32> to vector<8x32xf32>
    %489 = math.tanh %488 : vector<8x32xf32>
    %490 = vector.extract_strided_slice %475 {offsets = [0, 96], sizes = [8, 32], strides = [1, 1]} : vector<8x128xf32> to vector<8x32xf32>
    %491 = arith.negf %490 : vector<8x32xf32>
    %492 = math.exp %491 : vector<8x32xf32>
    %cst_111 = arith.constant 1.000000e+00 : f32
    %493 = vector.broadcast %cst_111 : f32 to vector<8x32xf32>
    %494 = arith.addf %493, %492 : vector<8x32xf32>
    %495 = arith.divf %493, %494 : vector<8x32xf32>
    %496 = arith.mulf %487, %436 : vector<8x32xf32>
    %497 = arith.mulf %481, %489 : vector<8x32xf32>
    %498 = arith.addf %496, %497 : vector<8x32xf32>
    %499 = math.tanh %498 : vector<8x32xf32>
    %500 = arith.mulf %495, %499 : vector<8x32xf32>
    %501 = tpu.concatenate %35, %500 in 1 : vector<8x32xf32>, vector<8x32xf32> -> vector<8x64xf32>
    %c0_112 = arith.constant 0 : index
    %c0_113 = arith.constant 0 : index
    %c0_114 = arith.constant 0 : index
    %502 = vector.load %arg10[%c0_112, %c0_113, %c0_114] : memref<8x8x64xf32, #tpu.memory_space<vmem>>, vector<1x8x64xf32>
    %503 = vector.shape_cast %502 : vector<1x8x64xf32> to vector<8x64xf32>
    %504 = vector.shape_cast %501 : vector<8x64xf32> to vector<1x8x64xf32>
    tpu.vector_store %arg10[%c0_112, %c0_113, %c0_114], %504 {strides = array<i32>} : memref<8x8x64xf32, #tpu.memory_space<vmem>>, vector<1x8x64xf32>,
    %505 = tpu.concatenate %97, %438 in 1 : vector<8x32xf32>, vector<8x32xf32> -> vector<8x64xf32>
    %c1_115 = arith.constant 1 : index
    %c0_116 = arith.constant 0 : index
    %c0_117 = arith.constant 0 : index
    %506 = vector.load %arg10[%c1_115, %c0_116, %c0_117] : memref<8x8x64xf32, #tpu.memory_space<vmem>>, vector<1x8x64xf32>
    %507 = vector.shape_cast %506 : vector<1x8x64xf32> to vector<8x64xf32>
    %508 = vector.shape_cast %505 : vector<8x64xf32> to vector<1x8x64xf32>
    tpu.vector_store %arg10[%c1_115, %c0_116, %c0_117], %508 {strides = array<i32>} : memref<8x8x64xf32, #tpu.memory_space<vmem>>, vector<1x8x64xf32>,
    %509 = tpu.concatenate %159, %376 in 1 : vector<8x32xf32>, vector<8x32xf32> -> vector<8x64xf32>
    %c2_118 = arith.constant 2 : index
    %c0_119 = arith.constant 0 : index
    %c0_120 = arith.constant 0 : index
    %510 = vector.load %arg10[%c2_118, %c0_119, %c0_120] : memref<8x8x64xf32, #tpu.memory_space<vmem>>, vector<1x8x64xf32>
    %511 = vector.shape_cast %510 : vector<1x8x64xf32> to vector<8x64xf32>
    %512 = vector.shape_cast %509 : vector<8x64xf32> to vector<1x8x64xf32>
    tpu.vector_store %arg10[%c2_118, %c0_119, %c0_120], %512 {strides = array<i32>} : memref<8x8x64xf32, #tpu.memory_space<vmem>>, vector<1x8x64xf32>,
    %513 = tpu.concatenate %221, %314 in 1 : vector<8x32xf32>, vector<8x32xf32> -> vector<8x64xf32>
    %c3_121 = arith.constant 3 : index
    %c0_122 = arith.constant 0 : index
    %c0_123 = arith.constant 0 : index
    %514 = vector.load %arg10[%c3_121, %c0_122, %c0_123] : memref<8x8x64xf32, #tpu.memory_space<vmem>>, vector<1x8x64xf32>
    %515 = vector.shape_cast %514 : vector<1x8x64xf32> to vector<8x64xf32>
    %516 = vector.shape_cast %513 : vector<8x64xf32> to vector<1x8x64xf32>
    tpu.vector_store %arg10[%c3_121, %c0_122, %c0_123], %516 {strides = array<i32>} : memref<8x8x64xf32, #tpu.memory_space<vmem>>, vector<1x8x64xf32>,
    %517 = tpu.concatenate %283, %252 in 1 : vector<8x32xf32>, vector<8x32xf32> -> vector<8x64xf32>
    %c4_124 = arith.constant 4 : index
    %c0_125 = arith.constant 0 : index
    %c0_126 = arith.constant 0 : index
    %518 = vector.load %arg10[%c4_124, %c0_125, %c0_126] : memref<8x8x64xf32, #tpu.memory_space<vmem>>, vector<1x8x64xf32>
    %519 = vector.shape_cast %518 : vector<1x8x64xf32> to vector<8x64xf32>
    %520 = vector.shape_cast %517 : vector<8x64xf32> to vector<1x8x64xf32>
    tpu.vector_store %arg10[%c4_124, %c0_125, %c0_126], %520 {strides = array<i32>} : memref<8x8x64xf32, #tpu.memory_space<vmem>>, vector<1x8x64xf32>,
    %521 = tpu.concatenate %345, %190 in 1 : vector<8x32xf32>, vector<8x32xf32> -> vector<8x64xf32>
    %c5_127 = arith.constant 5 : index
    %c0_128 = arith.constant 0 : index
    %c0_129 = arith.constant 0 : index
    %522 = vector.load %arg10[%c5_127, %c0_128, %c0_129] : memref<8x8x64xf32, #tpu.memory_space<vmem>>, vector<1x8x64xf32>
    %523 = vector.shape_cast %522 : vector<1x8x64xf32> to vector<8x64xf32>
    %524 = vector.shape_cast %521 : vector<8x64xf32> to vector<1x8x64xf32>
    tpu.vector_store %arg10[%c5_127, %c0_128, %c0_129], %524 {strides = array<i32>} : memref<8x8x64xf32, #tpu.memory_space<vmem>>, vector<1x8x64xf32>,
    %525 = tpu.concatenate %407, %128 in 1 : vector<8x32xf32>, vector<8x32xf32> -> vector<8x64xf32>
    %c6_130 = arith.constant 6 : index
    %c0_131 = arith.constant 0 : index
    %c0_132 = arith.constant 0 : index
    %526 = vector.load %arg10[%c6_130, %c0_131, %c0_132] : memref<8x8x64xf32, #tpu.memory_space<vmem>>, vector<1x8x64xf32>
    %527 = vector.shape_cast %526 : vector<1x8x64xf32> to vector<8x64xf32>
    %528 = vector.shape_cast %525 : vector<8x64xf32> to vector<1x8x64xf32>
    tpu.vector_store %arg10[%c6_130, %c0_131, %c0_132], %528 {strides = array<i32>} : memref<8x8x64xf32, #tpu.memory_space<vmem>>, vector<1x8x64xf32>,
    %529 = tpu.concatenate %469, %66 in 1 : vector<8x32xf32>, vector<8x32xf32> -> vector<8x64xf32>
    %c7_133 = arith.constant 7 : index
    %c0_134 = arith.constant 0 : index
    %c0_135 = arith.constant 0 : index
    %530 = vector.load %arg10[%c7_133, %c0_134, %c0_135] : memref<8x8x64xf32, #tpu.memory_space<vmem>>, vector<1x8x64xf32>
    %531 = vector.shape_cast %530 : vector<1x8x64xf32> to vector<8x64xf32>
    %532 = vector.shape_cast %529 : vector<8x64xf32> to vector<1x8x64xf32>
    tpu.vector_store %arg10[%c7_133, %c0_134, %c0_135], %532 {strides = array<i32>} : memref<8x8x64xf32, #tpu.memory_space<vmem>>, vector<1x8x64xf32>,
    %533 = tpu.concatenate %467, %498 in 1 : vector<8x32xf32>, vector<8x32xf32> -> vector<8x64xf32>
    %534 = tpu.concatenate %469, %500 in 1 : vector<8x32xf32>, vector<8x32xf32> -> vector<8x64xf32>
    %c0_136 = arith.constant 0 : index
    %c0_137 = arith.constant 0 : index
    %535 = vector.load %arg6[%c0_136, %c0_137] : memref<64x32xf32, #tpu.memory_space<vmem>>, vector<64x32xf32>
    %cst_138 = arith.constant dense<0.000000e+00> : vector<8x32xf32>
    %536 = tpu.matmul %533, %535, %cst_138 {dimension_numbers = #tpu.dot_dimension_numbers<[1], [0], [0], [1], [0, 0, 1, 1], [], []>} : vector<8x64xf32>, vector<64x32xf32>, vector<8x32xf32> -> vector<8x32xf32>
    %c0_139 = arith.constant 0 : index
    %c0_140 = arith.constant 0 : index
    %537 = vector.load %arg7[%c0_139, %c0_140] : memref<1x32xf32, #tpu.memory_space<vmem>>, vector<1x32xf32>
    %538 = vector.broadcast %537 : vector<1x32xf32> to vector<8x32xf32>
    %539 = arith.addf %536, %538 : vector<8x32xf32>
    %cst_141 = arith.constant 0.000000e+00 : f32
    %540 = vector.broadcast %cst_141 : f32 to vector<8x32xf32>
    %541 = arith.maximumf %539, %540 : vector<8x32xf32>
    %c0_142 = arith.constant 0 : index
    %c0_143 = arith.constant 0 : index
    %542 = vector.load %arg8[%c0_142, %c0_143] : memref<64x32xf32, #tpu.memory_space<vmem>>, vector<64x32xf32>
    %cst_144 = arith.constant dense<0.000000e+00> : vector<8x32xf32>
    %543 = tpu.matmul %534, %542, %cst_144 {dimension_numbers = #tpu.dot_dimension_numbers<[1], [0], [0], [1], [0, 0, 1, 1], [], []>} : vector<8x64xf32>, vector<64x32xf32>, vector<8x32xf32> -> vector<8x32xf32>
    %c0_145 = arith.constant 0 : index
    %c0_146 = arith.constant 0 : index
    %544 = vector.load %arg9[%c0_145, %c0_146] : memref<1x32xf32, #tpu.memory_space<vmem>>, vector<1x32xf32>
    %545 = vector.broadcast %544 : vector<1x32xf32> to vector<8x32xf32>
    %546 = arith.addf %543, %545 : vector<8x32xf32>
    %cst_147 = arith.constant 0.000000e+00 : f32
    %547 = vector.broadcast %cst_147 : f32 to vector<8x32xf32>
    %548 = arith.maximumf %546, %547 : vector<8x32xf32>
    %549 = tpu.concatenate %541, %548 in 1 : vector<8x32xf32>, vector<8x32xf32> -> vector<8x64xf32>
    %c0_148 = arith.constant 0 : index
    %c0_149 = arith.constant 0 : index
    %550 = vector.load %arg11[%c0_148, %c0_149] : memref<8x64xf32, #tpu.memory_space<vmem>>, vector<8x64xf32>
    tpu.vector_store %arg11[%c0_148, %c0_149], %549 {strides = array<i32>} : memref<8x64xf32, #tpu.memory_space<vmem>>, vector<8x64xf32>,
    return
  }
  func.func @transform_0(%arg0: i32) -> (i32, i32, i32) {
    %c0_i32 = arith.constant 0 : i32
    %c0_i32_0 = arith.constant 0 : i32
    %c0_i32_1 = arith.constant 0 : i32
    %c0_i32_2 = arith.constant 0 : i32
    return %c0_i32, %c0_i32_0, %c0_i32_1 : i32, i32, i32
  }
  func.func @transform_1(%arg0: i32) -> (i32, i32) {
    %c0_i32 = arith.constant 0 : i32
    %c0_i32_0 = arith.constant 0 : i32
    %c0_i32_1 = arith.constant 0 : i32
    return %c0_i32, %c0_i32_0 : i32, i32
  }
  func.func @transform_2(%arg0: i32) -> (i32, i32) {
    %c0_i32 = arith.constant 0 : i32
    %c0_i32_0 = arith.constant 0 : i32
    %c0_i32_1 = arith.constant 0 : i32
    return %c0_i32, %c0_i32_0 : i32, i32
  }
  func.func @transform_3(%arg0: i32) -> (i32, i32) {
    %c0_i32 = arith.constant 0 : i32
    %c0_i32_0 = arith.constant 0 : i32
    %c0_i32_1 = arith.constant 0 : i32
    return %c0_i32, %c0_i32_0 : i32, i32
  }
  func.func @transform_4(%arg0: i32) -> (i32, i32) {
    %c0_i32 = arith.constant 0 : i32
    %c0_i32_0 = arith.constant 0 : i32
    %c0_i32_1 = arith.constant 0 : i32
    return %c0_i32, %c0_i32_0 : i32, i32
  }
  func.func @transform_5(%arg0: i32) -> (i32, i32) {
    %c0_i32 = arith.constant 0 : i32
    %c0_i32_0 = arith.constant 0 : i32
    %c0_i32_1 = arith.constant 0 : i32
    return %c0_i32, %c0_i32_0 : i32, i32
  }
  func.func @transform_6(%arg0: i32) -> (i32, i32) {
    %c0_i32 = arith.constant 0 : i32
    %c0_i32_0 = arith.constant 0 : i32
    %c0_i32_1 = arith.constant 0 : i32
    return %c0_i32, %c0_i32_0 : i32, i32
  }
  func.func @transform_7(%arg0: i32) -> (i32, i32) {
    %c0_i32 = arith.constant 0 : i32
    %c0_i32_0 = arith.constant 0 : i32
    %c0_i32_1 = arith.constant 0 : i32
    return %c0_i32, %c0_i32_0 : i32, i32
  }
  func.func @transform_8(%arg0: i32) -> (i32, i32) {
    %c0_i32 = arith.constant 0 : i32
    %c0_i32_0 = arith.constant 0 : i32
    %c0_i32_1 = arith.constant 0 : i32
    return %c0_i32, %c0_i32_0 : i32, i32
  }
  func.func @transform_9(%arg0: i32) -> (i32, i32, i32) {
    %c0_i32 = arith.constant 0 : i32
    %c0_i32_0 = arith.constant 0 : i32
    %c0_i32_1 = arith.constant 0 : i32
    %c0_i32_2 = arith.constant 0 : i32
    return %c0_i32, %c0_i32_0, %c0_i32_1 : i32, i32, i32
  }
  func.func @transform_10(%arg0: i32) -> (i32, i32) {
    %c0_i32 = arith.constant 0 : i32
    %c0_i32_0 = arith.constant 0 : i32
    %c0_i32_1 = arith.constant 0 : i32
    return %c0_i32, %c0_i32_0 : i32, i32
  }
}

</mosaic_0001>

<bundles_post_ra>
// kernel: tpu_custom_call.1
= control target key start
LH: loop header
LB: loop body
LE: loop exit
PB: predicated region body
PF: predicated region fallthrough
CT: control target
= control target key end

     0   :  { %16 = vsyncpa [#allocation3], 0  ;;  %s2203_s0 = inlined_call_operand.vmem [shape: f32[8,8,32], index: 0, kind: input, shape index: {}]   ;;  %s2204_s1 = inlined_call_operand.vmem [shape: f32[64,128], index: 1, kind: input, shape index: {}]   ;;  %s2205_s2 = inlined_call_operand.vmem [shape: f32[1,128], index: 2, kind: input, shape index: {}]   ;;  %s2206_s3 = inlined_call_operand.hbm [shape: f32[64,128], index: 3, kind: input, shape index: {}]   ;;  %s2207_s4 = inlined_call_operand.vmem [shape: f32[1,128], index: 4, kind: input, shape index: {}]   ;;  %s2208_s5 = inlined_call_operand.vmem [shape: f32[64,32], index: 5, kind: input, shape index: {}]   ;;  %s2209_s6 = inlined_call_operand.vmem [shape: f32[1,32], index: 6, kind: input, shape index: {}]   ;;  %s2210_s7 = inlined_call_operand.vmem [shape: f32[64,32], index: 7, kind: input, shape index: {}]   ;;  %s2211_s8 = inlined_call_operand.vmem [shape: f32[1,32], index: 8, kind: input, shape index: {}]   ;;  %s2212_s9 = inlined_call_operand.hbm [shape: f32[8,8,64], index: 9, kind: output, shape index: {0}]   ;;  %s2213_s10 = inlined_call_operand.hbm [shape: f32[8,64], index: 10, kind: output, shape index: {1}]  }
   0x1   :  { %17 = vsyncpa [#allocation4], 0 }
   0x2   :  { %18 = vsyncpa [#allocation7], 0  ;;  %s29_s15 = sshll.u32 %s2206_s3, 4  ;;  %s1559_s16 = smov [#allocation2]   ;;  %s30_s15 = int_to_ptr.hbm [resolvable:$true] %s29_s15 }
   0x3   :  { %s31_s17 = sshll.u32 %s1559_s16, 4  ;;  %s1560_s18 = smov 128   ;;  %s32_s17 = int_to_ptr.vmem [resolvable:$true] %s31_s17 }
   0x4   :  { %s1561_s19 = smov 8  }
   0x5   :  { %37 = dma.hbm_to_vmem [thread:$0]  %s30_s15, 1024, %s32_s17, [#allocation3], %s1560_s18, %s1560_s18, %s1561_s19  }
   0x6   :  { %1553 = dma.done.wait [#allocation3], 1024  }
   0x7   :  { %1554 = vsyncadd [#allocation3], 4294966272  ;;  %v1631_v0 = vld [vmem:[%s2204_s1 + $0x38] sm:$0xff]  ;;  %v1636_v1 = vld [vmem:[%s2204_s1 + $0x30] sm:$0xff]  ;;  %vm71_vm0 = vcmask 261120   ;;  %vm76_vm1 = vcmask 523264  }
   0x8   :  { %88 = vmatpush.msra.mxu0 %v1631_v0  ;;  %v1639_v2 = vld [vmem:[#allocation2 + $0x38] sm:$0xff]  ;;  %221 = vmatpush.msra.mxu2 %v1631_v0  ;;  %v1645_v3 = vld [vmem:[%s2204_s1 + $0x28] sm:$0xff]  ;;  %v1648_v4 = vld [vmem:[#allocation2 + $0x30] sm:$0xff]  ;;  %s1562_s3 = smov 64   ;;  %s1563_s24 = smov 32  }
   0x9   :  { %154 = vmatpush.msra.mxu1 %v1639_v2  ;;  %288 = vmatpush.msra.mxu3 %v1639_v2  ;;  %v1652_v5 = vld [vmem:[#allocation2 + $0x28] sm:$0xff]  ;;  %v1658_v6 = vld [vmem:[%s2204_s1 + $0x20] sm:$0xff]  ;;  %v1669_v8 = vld [vmem:[%s2204_s1 + $0x18] sm:$0xff]  ;;  %s1267_s17 = sshll.u32 %s2212_s9, 4  ;;  %s1566_s9 = smov [#allocation6]   ;;  %s1268_s17 = int_to_ptr.hbm [resolvable:$true] %s1267_s17 }
   0xa   :  { %89 = vmatpush.msra.mxu0 %v1636_v1  ;;  %222 = vmatpush.msra.mxu2 %v1636_v1  ;;  %v1663_v7 = vld [vmem:[#allocation2 + $0x20] sm:$0xff]  ;;  %v1672_v9 = vld [vmem:[#allocation2 + $0x18] sm:$0xff]  ;;  %v1680_v10 = vld [vmem:[%s2204_s1 + $0x10] sm:$0xff] }
   0xb   :  { %155 = vmatpush.msra.mxu1 %v1648_v4  ;;  %289 = vmatpush.msra.mxu3 %v1648_v4  ;;  %v1685_v11 = vld [vmem:[#allocation2 + $0x10] sm:$0xff]  ;;  %v1691_v12 = vld [vmem:[%s2204_s1 + $0x8] sm:$0xff]  ;;  %v70_v13 = vld [vmem:[%s2203_s0] sm:$0xff] }
   0xc   :  { %90 = vmatpush.msra.mxu0 %v1645_v3  ;;  %223 = vmatpush.msra.mxu2 %v1645_v3  ;;  %v1699_v14 = vld [vmem:[#allocation2 + $0x8] sm:$0xff]  ;;  %v1298_v15 = vld [vmem:[%s2203_s0 + $0x38] sm:$0xff]  ;;  %v1708_v16 = vld [vmem:[%s2204_s1] sm:$0xff]  ;;  %v72_v17 = vsel %vm71_vm0, %v70_v13, 0.0 }
   0xd   :  { %156 = vmatpush.msra.mxu1 %v1652_v5  ;;  %290 = vmatpush.msra.mxu3 %v1652_v5  ;;  %v1714_v18 = vld [vmem:[#allocation2] sm:$0xff]  ;;  %v139_v19 = vsel %vm71_vm0, %v1298_v15, 0.0 }
   0xe   :  { %91 = vmatpush.msra.mxu0 %v1658_v6  ;;  %224 = vmatpush.msra.mxu2 %v1658_v6  ;;  %v1777_v20 = vld [vmem:[%s2205_s2] ss:$0 sm:$0xff] }
   0xf   :  { %157 = vmatpush.msra.mxu1 %v1663_v7  ;;  %291 = vmatpush.msra.mxu3 %v1663_v7  ;;  %v1783_v23 = vld [vmem:[%s2207_s4] ss:$0 sm:$0xff] }
  0x10   :  { %92 = vmatpush.msra.mxu0 %v1669_v8  ;;  %225 = vmatpush.msra.mxu2 %v1669_v8 }
  0x11   :  { %158 = vmatpush.msra.mxu1 %v1672_v9  ;;  %292 = vmatpush.msra.mxu3 %v1672_v9 }
  0x12   :  { %93 = vmatpush.msra.mxu0 %v1680_v10  ;;  %226 = vmatpush.msra.mxu2 %v1680_v10 }
  0x13   :  { %159 = vmatpush.msra.mxu1 %v1685_v11  ;;  %293 = vmatpush.msra.mxu3 %v1685_v11 }
  0x14   :  { %94 = vmatpush.msra.mxu0 %v1691_v12  ;;  %227 = vmatpush.msra.mxu2 %v1691_v12 }
  0x15   :  { %160 = vmatpush.msra.mxu1 %v1699_v14  ;;  %294 = vmatpush.msra.mxu3 %v1699_v14 }
  0x16   :  { %95 = vmatpush.msra.mxu0 %v1708_v16  ;;  %228 = vmatpush.msra.mxu2 %v1708_v16 }
  0x17   :  { %1296 = vmatmul.msk.f32.vlgmr.msra.gmra.mxu0 %vm76_vm1, %v72_v17  ;;  %161 = vmatpush.msra.mxu1 %v1714_v18 }
  0x18   :  { %1299 = vmatmul.msk.f32.vlgmr.msra.gmra.mxu1 %vm76_vm1, %v139_v19  ;;  %295 = vmatpush.msra.mxu3 %v1714_v18 }
  0x19   :  { %355 = vmatpush.msrb.mxu0 %v1631_v0  ;;  %422 = vmatpush.msrb.mxu1 %v1639_v2 }
  0x1a   :  { %489 = vmatpush.msrb.mxu2 %v1631_v0  ;;  %556 = vmatpush.msrb.mxu3 %v1639_v2 }
  0x1b   :  { %356 = vmatpush.msrb.mxu0 %v1636_v1  ;;  %423 = vmatpush.msrb.mxu1 %v1648_v4 }
  0x1c   :  { %490 = vmatpush.msrb.mxu2 %v1636_v1  ;;  %557 = vmatpush.msrb.mxu3 %v1648_v4 }
  0x1d   :  { %357 = vmatpush.msrb.mxu0 %v1645_v3  ;;  %424 = vmatpush.msrb.mxu1 %v1652_v5 }
  0x1e   :  { %491 = vmatpush.msrb.mxu2 %v1645_v3  ;;  %558 = vmatpush.msrb.mxu3 %v1652_v5 }
  0x1f   :  { %358 = vmatpush.msrb.mxu0 %v1658_v6  ;;  %425 = vmatpush.msrb.mxu1 %v1663_v7 }
  0x20   :  { %492 = vmatpush.msrb.mxu2 %v1658_v6  ;;  %559 = vmatpush.msrb.mxu3 %v1663_v7 }
  0x21   :  { %359 = vmatpush.msrb.mxu0 %v1669_v8  ;;  %426 = vmatpush.msrb.mxu1 %v1672_v9 }
  0x22   :  { %493 = vmatpush.msrb.mxu2 %v1669_v8  ;;  %560 = vmatpush.msrb.mxu3 %v1672_v9 }
  0x23   :  { %360 = vmatpush.msrb.mxu0 %v1680_v10  ;;  %427 = vmatpush.msrb.mxu1 %v1685_v11 }
  0x24   :  { %494 = vmatpush.msrb.mxu2 %v1680_v10  ;;  %561 = vmatpush.msrb.mxu3 %v1685_v11 }
  0x25   :  { %361 = vmatpush.msrb.mxu0 %v1691_v12  ;;  %428 = vmatpush.msrb.mxu1 %v1699_v14 }
  0x26   :  { %495 = vmatpush.msrb.mxu2 %v1691_v12  ;;  %562 = vmatpush.msrb.mxu3 %v1699_v14 }
  0x27   :  { %362 = vmatpush.msrb.mxu0 %v1708_v16  ;;  %429 = vmatpush.msrb.mxu1 %v1714_v18 }
  0x28   :  { %496 = vmatpush.msrb.mxu2 %v1708_v16  ;;  %563 = vmatpush.msrb.mxu3 %v1714_v18 }
  0x29   :  { %621 = vmatpush.msra.mxu0 %v1631_v0  ;;  %686 = vmatpush.msra.mxu1 %v1639_v2 }
  0x2b   :  { %622 = vmatpush.msra.mxu0 %v1636_v1  ;;  %687 = vmatpush.msra.mxu1 %v1648_v4 }
  0x2d   :  { %623 = vmatpush.msra.mxu0 %v1645_v3  ;;  %688 = vmatpush.msra.mxu1 %v1652_v5 }
  0x2f   :  { %624 = vmatpush.msra.mxu0 %v1658_v6  ;;  %689 = vmatpush.msra.mxu1 %v1663_v7 }
  0x31   :  { %625 = vmatpush.msra.mxu0 %v1669_v8  ;;  %690 = vmatpush.msra.mxu1 %v1672_v9 }
  0x33   :  { %626 = vmatpush.msra.mxu0 %v1680_v10  ;;  %691 = vmatpush.msra.mxu1 %v1685_v11 }
  0x35   :  { %627 = vmatpush.msra.mxu0 %v1691_v12  ;;  %692 = vmatpush.msra.mxu1 %v1699_v14 }
  0x37   :  { %628 = vmatpush.msra.mxu0 %v1708_v16  ;;  %693 = vmatpush.msra.mxu1 %v1714_v18 }
  0x94   :  { %v97_v21 = vpop.f32.mrf.mxu0 }
  0x95   :  { %v98_v22 = vadd.f32 %v1777_v20, %v97_v21  ;;  %v163_v24 = vpop.f32.mrf.mxu1 }
  0x96   :  { %v164_v25 = vadd.f32 %v1783_v23, %v163_v24  ;;  %v1806_v24 = vld [vmem:[%s2203_s0 + $0x8] sm:$0xff] }
  0x97   :  { %1349 = vtanh.f32 %v98_v22  ;;  %v1297_v28 = vmul.f32 -1.442695, %v98_v22 }
  0x98   :  { %1351 = vtanh.f32 %v164_v25  ;;  %v1300_v29 = vmul.f32 -1.442695, %v164_v25 }
  0x99   :  { %1353 = vpow2.f32 %v1297_v28 }
  0x9a   :  { %1355 = vpow2.f32 %v1300_v29 }
  0x9d   :  { %v1350_v26 = vpop.eup %1349 }
  0x9e   :  { %122 = vrot.lane.b32.xlu0 %v1350_v26, %s1562_s3  ;;  %v1352_v27 = vpop.eup %1351 }
  0x9f   :  { %v1354_v30 = vpop.eup %1353 }
  0xa0   :  { %v103_v31 = vadd.f32 1.0, %v1354_v30  ;;  %v1356_v32 = vpop.eup %1355 }
  0xa1   :  { %v169_v33 = vadd.f32 1.0, %v1356_v32 }
  0xa2   :  { %1357 = vrcp.f32 %v103_v31  ;;  %v115_v42 = vand.u32 2147483648, %v103_v31  ;;  %vm109_vm3 = vweird.f32 %v103_v31  ;;  %v113_v43 = vand.u32 2147483647, %v103_v31 }
  0xa3   :  { %1359 = vrcp.f32 %v169_v33  ;;  %vm175_vm6 = vweird.f32 %v169_v33  ;;  %v181_v49 = vand.u32 2147483648, %v169_v33  ;;  %v179_v52 = vand.u32 2147483647, %v169_v33 }
  0xa4   :  { %v116_v46 = vor.u32 1.1754944e-38, %v115_v42  ;;  %vm114_vm5 = vcmp.eq.f32.partialorder %v113_v43, 8.507059e+37 }
  0xa5   :  { %v182_v53 = vor.u32 1.1754944e-38, %v181_v49  ;;  %vm180_vm9 = vcmp.eq.f32.partialorder %v179_v52, 8.507059e+37 }
  0xa6   :  { %188 = vrot.lane.b32.xlu0 %v1352_v27, %s1562_s3  ;;  %v1816_v27 = vld [vmem:[%s2203_s0 + $0x30] sm:$0xff] }
  0xa8   :  { %v1358_v34 = vpop.eup %1357 }
  0xa9   :  { %v105_v35 = vmul.f32 %v1358_v34, %v103_v31  ;;  %v1360_v37 = vpop.eup %1359  ;;  %vm110_vm2 = vweird.f32 %v1358_v34 }
  0xaa   :  { %v171_v39 = vmul.f32 %v1360_v37, %v169_v33  ;;  %vm111_vm4 = vmor %vm109_vm3, %vm110_vm2  ;;  %vm176_vm7 = vweird.f32 %v1360_v37 }
  0xab   :  { %v106_v36 = vsub.f32 1.0, %v105_v35  ;;  %vm177_vm8 = vmor %vm175_vm6, %vm176_vm7 }
  0xac   :  { %v172_v41 = vsub.f32 1.0, %v171_v39 }
  0xad   :  { %v107_v38 = vmul.f32 %v1358_v34, %v106_v36 }
  0xae   :  { %v173_v45 = vmul.f32 %v1360_v37, %v172_v41 }
  0xaf   :  { %v108_v40 = vadd.f32 %v1358_v34, %v107_v38 }
  0xb0   :  { %v174_v51 = vadd.f32 %v1360_v37, %v173_v45 }
  0xb1   :  { %v112_v44 = vsel %vm111_vm4, %v1358_v34, %v108_v40 }
  0xb2   :  { %v117_v48 = vsel %vm114_vm5, %v116_v46, %v112_v44  ;;  %v178_v54 = vsel %vm177_vm8, %v1360_v37, %v174_v51 }
  0xb3   :  { %v183_v55 = vsel %vm180_vm9, %v182_v53, %v178_v54  ;;  %v120_v58 = vmul.f32 0.0, %v117_v48 }
  0xb4   :  { %v186_v61 = vmul.f32 0.0, %v183_v55 }
 0x110   :  { %v123_v47 = vpop.permute.xlu0 %122 }
 0x111   :  { %v125_v50 = vmul.f32 %v123_v47, %v117_v48 }
 0x113   :  { %127 = vrot.lane.b32.xlu1 %v125_v50, %s1563_s24 }
 0x118   :  { %v189_v56 = vpop.permute.xlu0 %188 }
 0x119   :  { %v191_v57 = vmul.f32 %v189_v56, %v183_v55 }
 0x11b   :  { %193 = vrot.lane.b32.xlu1 %v191_v57, %s1563_s24 }
 0x185   :  { %v128_v59 = vpop.permute.xlu1 %127 }
 0x186   :  { %v1790_v60 = vadd.f32 %v128_v59, %v120_v58 }
 0x188   :  { %1361 = vtanh.f32 %v1790_v60 }
 0x18d   :  { %v194_v62 = vpop.permute.xlu1 %193 }
 0x18e   :  { %v1362_v63 = vpop.eup %1361  ;;  %v1793_v13 = vadd.f32 %v194_v62, %v186_v61 }
 0x18f   :  { %133 = vrot.lane.b32.xlu2 %v1362_v63, %s1562_s3 }
 0x190   :  { %1363 = vtanh.f32 %v1793_v13 }
 0x196   :  { %v1364_v15 = vpop.eup %1363 }
 0x197   :  { %199 = vrot.lane.b32.xlu2 %v1364_v15, %s1562_s3 }
 0x1e9   :  { %v134_v17 = vpop.permute.xlu2 %133 }
 0x1ea   :  { %v1798_v19 = vmul.f32 %v134_v17, %v117_v48 }
 0x1ec   :  { %206 = vrot.lane.b32.xlu0 %v1798_v19, %s1562_s3 }
 0x1f1   :  { %v200_v21 = vpop.permute.xlu2 %199 }
 0x1f2   :  { %v202_v22 = vmul.f32 %v200_v21, %v183_v55 }
 0x1f4   :  { %273 = vrot.lane.b32.xlu1 %v202_v22, %s1562_s3 }
 0x25e   :  { %v207_v25 = vpop.permute.xlu0 %206 }
 0x25f   :  { %v209_v26 = vsel %vm71_vm0, %v1806_v24, %v207_v25 }
 0x260   :  { %1302 = vmatmul.msk.f32.vlgmr.msra.gmra.mxu2 %vm76_vm1, %v209_v26 }
 0x261   :  { %751 = vmatpush.msra.mxu2 %v1631_v0 }
 0x263   :  { %752 = vmatpush.msra.mxu2 %v1636_v1 }
 0x265   :  { %753 = vmatpush.msra.mxu2 %v1645_v3 }
 0x266   :  { %v1819_v28 = vpop.permute.xlu1 %273 }
 0x267   :  { %v276_v29 = vsel %vm71_vm0, %v1816_v27, %v1819_v28  ;;  %754 = vmatpush.msra.mxu2 %v1658_v6 }
 0x268   :  { %1305 = vmatmul.msk.f32.vlgmr.msra.gmra.mxu3 %vm76_vm1, %v276_v29 }
 0x269   :  { %755 = vmatpush.msra.mxu2 %v1669_v8  ;;  %816 = vmatpush.msra.mxu3 %v1639_v2 }
 0x26b   :  { %756 = vmatpush.msra.mxu2 %v1680_v10  ;;  %817 = vmatpush.msra.mxu3 %v1648_v4 }
 0x26d   :  { %757 = vmatpush.msra.mxu2 %v1691_v12  ;;  %818 = vmatpush.msra.mxu3 %v1652_v5 }
 0x26f   :  { %758 = vmatpush.msra.mxu2 %v1708_v16  ;;  %819 = vmatpush.msra.mxu3 %v1663_v7 }
 0x271   :  { %820 = vmatpush.msra.mxu3 %v1672_v9 }
 0x273   :  { %821 = vmatpush.msra.mxu3 %v1685_v11 }
 0x275   :  { %822 = vmatpush.msra.mxu3 %v1699_v14 }
 0x277   :  { %823 = vmatpush.msra.mxu3 %v1714_v18 }
 0x2e3   :  { %v230_v30 = vpop.f32.mrf.mxu2 }
 0x2e4   :  { %v231_v31 = vadd.f32 %v1777_v20, %v230_v30 }
 0x2e6   :  { %1365 = vtanh.f32 %v231_v31  ;;  %v1303_v36 = vmul.f32 -1.442695, %v231_v31 }
 0x2eb   :  { %v297_v32 = vpop.f32.mrf.mxu3 }
 0x2ec   :  { %v1366_v33 = vpop.eup %1365  ;;  %v298_v34 = vadd.f32 %v1783_v23, %v297_v32 }
 0x2ed   :  { %255 = vrot.lane.b32.xlu2 %v1366_v33, %s1562_s3 }
 0x2ee   :  { %1367 = vtanh.f32 %v298_v34  ;;  %v1306_v42 = vmul.f32 -1.442695, %v298_v34 }
 0x2ef   :  { %1369 = vpow2.f32 %v1303_v36 }
 0x2f4   :  { %v1368_v35 = vpop.eup %1367 }
 0x2f5   :  { %322 = vrot.lane.b32.xlu0 %v1368_v35, %s1562_s3  ;;  %v1370_v37 = vpop.eup %1369 }
 0x2f6   :  { %v236_v38 = vadd.f32 1.0, %v1370_v37 }
 0x2f8   :  { %1371 = vrcp.f32 %v236_v38  ;;  %v248_v45 = vand.u32 2147483648, %v236_v38  ;;  %vm242_vm11 = vweird.f32 %v236_v38  ;;  %v246_v46 = vand.u32 2147483647, %v236_v38 }
 0x2f9   :  { %1373 = vpow2.f32 %v1306_v42 }
 0x2fa   :  { %v249_v49 = vor.u32 1.1754944e-38, %v248_v45  ;;  %vm247_vm13 = vcmp.eq.f32.partialorder %v246_v46, 8.507059e+37 }
 0x2fe   :  { %v1372_v39 = vpop.eup %1371 }
 0x2ff   :  { %v238_v40 = vmul.f32 %v1372_v39, %v236_v38  ;;  %vm243_vm10 = vweird.f32 %v1372_v39  ;;  %v1374_v47 = vpop.eup %1373 }
 0x300   :  { %vm244_vm12 = vmor %vm242_vm11, %vm243_vm10  ;;  %v303_v50 = vadd.f32 1.0, %v1374_v47 }
 0x301   :  { %v239_v41 = vsub.f32 1.0, %v238_v40 }
 0x302   :  { %1375 = vrcp.f32 %v303_v50  ;;  %v315_v59 = vand.u32 2147483648, %v303_v50  ;;  %vm309_vm15 = vweird.f32 %v303_v50  ;;  %v313_v61 = vand.u32 2147483647, %v303_v50 }
 0x303   :  { %v240_v43 = vmul.f32 %v1372_v39, %v239_v41 }
 0x304   :  { %v316_v63 = vor.u32 1.1754944e-38, %v315_v59  ;;  %vm314_vm3 = vcmp.eq.f32.partialorder %v313_v61, 8.507059e+37 }
 0x305   :  { %v241_v44 = vadd.f32 %v1372_v39, %v240_v43 }
 0x307   :  { %v245_v48 = vsel %vm244_vm12, %v1372_v39, %v241_v44  ;;  %v1878_v39 = vld [vmem:[%s2203_s0 + $0x28] sm:$0xff] }
 0x308   :  { %v250_v51 = vsel %vm247_vm13, %v249_v49, %v245_v48  ;;  %v1376_v54 = vpop.eup %1375 }
 0x309   :  { %v305_v55 = vmul.f32 %v1376_v54, %v303_v50  ;;  %vm310_vm14 = vweird.f32 %v1376_v54  ;;  %v253_v22 = vmul.f32 %v250_v51, %v1790_v60 }
 0x30a   :  { %vm311_vm2 = vmor %vm309_vm15, %vm310_vm14 }
 0x30b   :  { %v306_v56 = vsub.f32 1.0, %v305_v55 }
 0x30d   :  { %v307_v57 = vmul.f32 %v1376_v54, %v306_v56 }
 0x30f   :  { %v308_v58 = vadd.f32 %v1376_v54, %v307_v57 }
 0x311   :  { %v312_v62 = vsel %vm311_vm2, %v1376_v54, %v308_v58 }
 0x312   :  { %v317_v17 = vsel %vm314_vm3, %v316_v63, %v312_v62 }
 0x313   :  { %v320_v29 = vmul.f32 %v317_v17, %v1793_v13  ;;  %v1862_v13 = vld [vmem:[%s2203_s0 + $0x10] sm:$0xff] }
 0x347   :  { %v256_v52 = vpop.permute.xlu2 %255 }
 0x348   :  { %v258_v53 = vmul.f32 %v256_v52, %v250_v51 }
 0x34a   :  { %260 = vrot.lane.b32.xlu1 %v258_v53, %s1563_s24 }
 0x367   :  { %v323_v15 = vpop.permute.xlu0 %322 }
 0x368   :  { %v325_v21 = vmul.f32 %v323_v15, %v317_v17 }
 0x36a   :  { %327 = vrot.lane.b32.xlu2 %v325_v21, %s1563_s24 }
 0x3bc   :  { %v261_v25 = vpop.permute.xlu1 %260 }
 0x3bd   :  { %v1845_v26 = vadd.f32 %v261_v25, %v253_v22 }
 0x3bf   :  { %1377 = vtanh.f32 %v1845_v26 }
 0x3c4   :  { %v328_v30 = vpop.permute.xlu2 %327 }
 0x3c5   :  { %v1378_v31 = vpop.eup %1377  ;;  %v1849_v32 = vadd.f32 %v328_v30, %v320_v29 }
 0x3c6   :  { %266 = vrot.lane.b32.xlu0 %v1378_v31, %s1562_s3 }
 0x3c7   :  { %1379 = vtanh.f32 %v1849_v32 }
 0x3cd   :  { %v1380_v33 = vpop.eup %1379 }
 0x3ce   :  { %333 = vrot.lane.b32.xlu1 %v1380_v33, %s1562_s3 }
 0x438   :  { %v267_v34 = vpop.permute.xlu0 %266 }
 0x439   :  { %v1854_v60 = vmul.f32 %v267_v34, %v250_v51 }
 0x43b   :  { %340 = vrot.lane.b32.xlu2 %v1854_v60, %s1562_s3 }
 0x440   :  { %v334_v35 = vpop.permute.xlu1 %333 }
 0x441   :  { %v336_v36 = vmul.f32 %v334_v35, %v317_v17 }
 0x443   :  { %407 = vrot.lane.b32.xlu0 %v336_v36, %s1562_s3 }
 0x495   :  { %v341_v37 = vpop.permute.xlu2 %340 }
 0x496   :  { %v343_v38 = vsel %vm71_vm0, %v1862_v13, %v341_v37 }
 0x497   :  { %1308 = vmatmul.msk.f32.vlgmr.msrb.gmra.mxu0 %vm76_vm1, %v343_v38 }
 0x498   :  { %881 = vmatpush.msrb.mxu0 %v1631_v0 }
 0x49a   :  { %882 = vmatpush.msrb.mxu0 %v1636_v1 }
 0x49c   :  { %883 = vmatpush.msrb.mxu0 %v1645_v3 }
 0x49e   :  { %884 = vmatpush.msrb.mxu0 %v1658_v6 }
 0x4a0   :  { %885 = vmatpush.msrb.mxu0 %v1669_v8 }
 0x4a2   :  { %886 = vmatpush.msrb.mxu0 %v1680_v10 }
 0x4a4   :  { %887 = vmatpush.msrb.mxu0 %v1691_v12 }
 0x4a6   :  { %888 = vmatpush.msrb.mxu0 %v1708_v16 }
 0x4b5   :  { %v1880_v40 = vpop.permute.xlu0 %407 }
 0x4b6   :  { %v410_v41 = vsel %vm71_vm0, %v1878_v39, %v1880_v40 }
 0x4b7   :  { %1311 = vmatmul.msk.f32.vlgmr.msrb.gmra.mxu1 %vm76_vm1, %v410_v41 }
 0x4b8   :  { %946 = vmatpush.msrb.mxu1 %v1639_v2 }
 0x4ba   :  { %947 = vmatpush.msrb.mxu1 %v1648_v4 }
 0x4bc   :  { %948 = vmatpush.msrb.mxu1 %v1652_v5 }
 0x4be   :  { %949 = vmatpush.msrb.mxu1 %v1663_v7 }
 0x4c0   :  { %950 = vmatpush.msrb.mxu1 %v1672_v9 }
 0x4c2   :  { %951 = vmatpush.msrb.mxu1 %v1685_v11 }
 0x4c4   :  { %952 = vmatpush.msrb.mxu1 %v1699_v14 }
 0x4c6   :  { %953 = vmatpush.msrb.mxu1 %v1714_v18 }
 0x514   :  { %v364_v42 = vpop.f32.mrf.mxu0 }
 0x515   :  { %v365_v43 = vadd.f32 %v1777_v20, %v364_v42 }
 0x517   :  { %1381 = vtanh.f32 %v365_v43  ;;  %v1309_v48 = vmul.f32 -1.442695, %v365_v43 }
 0x51d   :  { %v1382_v44 = vpop.eup %1381 }
 0x51e   :  { %389 = vrot.lane.b32.xlu1 %v1382_v44, %s1562_s3 }
 0x534   :  { %v431_v45 = vpop.f32.mrf.mxu1 }
 0x535   :  { %v432_v46 = vadd.f32 %v1783_v23, %v431_v45 }
 0x537   :  { %1383 = vtanh.f32 %v432_v46  ;;  %v1312_v49 = vmul.f32 -1.442695, %v432_v46 }
 0x538   :  { %1385 = vpow2.f32 %v1309_v48 }
 0x539   :  { %1387 = vpow2.f32 %v1312_v49 }
 0x53d   :  { %v1384_v47 = vpop.eup %1383 }
 0x53e   :  { %456 = vrot.lane.b32.xlu2 %v1384_v47, %s1562_s3  ;;  %v1386_v50 = vpop.eup %1385 }
 0x53f   :  { %v370_v51 = vadd.f32 1.0, %v1386_v50  ;;  %v1388_v52 = vpop.eup %1387 }
 0x540   :  { %v437_v53 = vadd.f32 1.0, %v1388_v52 }
 0x541   :  { %1389 = vrcp.f32 %v370_v51  ;;  %v382_v63 = vand.u32 2147483648, %v370_v51  ;;  %vm376_vm5 = vweird.f32 %v370_v51  ;;  %v380_v15 = vand.u32 2147483647, %v370_v51 }
 0x542   :  { %1391 = vrcp.f32 %v437_v53  ;;  %v449_v33 = vand.u32 2147483648, %v437_v53  ;;  %vm443_vm9 = vweird.f32 %v437_v53  ;;  %v447_v34 = vand.u32 2147483647, %v437_v53 }
 0x543   :  { %v383_v22 = vor.u32 1.1754944e-38, %v382_v63  ;;  %vm381_vm7 = vcmp.eq.f32.partialorder %v380_v15, 8.507059e+37 }
 0x544   :  { %v450_v36 = vor.u32 1.1754944e-38, %v449_v33  ;;  %vm448_vm11 = vcmp.eq.f32.partialorder %v447_v34, 8.507059e+37 }
 0x547   :  { %v1390_v54 = vpop.eup %1389 }
 0x548   :  { %v372_v55 = vmul.f32 %v1390_v54, %v370_v51  ;;  %v1392_v57 = vpop.eup %1391  ;;  %vm377_vm4 = vweird.f32 %v1390_v54 }
 0x549   :  { %v439_v59 = vmul.f32 %v1392_v57, %v437_v53  ;;  %vm378_vm6 = vmor %vm376_vm5, %vm377_vm4  ;;  %vm444_vm8 = vweird.f32 %v1392_v57 }
 0x54a   :  { %v373_v56 = vsub.f32 1.0, %v372_v55  ;;  %vm445_vm10 = vmor %vm443_vm9, %vm444_vm8  ;;  %v1928_v55 = vld [vmem:[%s2203_s0 + $0x20] sm:$0xff] }
 0x54b   :  { %v440_v62 = vsub.f32 1.0, %v439_v59 }
 0x54c   :  { %v374_v58 = vmul.f32 %v1390_v54, %v373_v56 }
 0x54d   :  { %v441_v21 = vmul.f32 %v1392_v57, %v440_v62 }
 0x54e   :  { %v375_v61 = vadd.f32 %v1390_v54, %v374_v58 }
 0x54f   :  { %v442_v31 = vadd.f32 %v1392_v57, %v441_v21 }
 0x550   :  { %v379_v17 = vsel %vm378_vm6, %v1390_v54, %v375_v61 }
 0x551   :  { %v384_v29 = vsel %vm381_vm7, %v383_v22, %v379_v17  ;;  %v446_v35 = vsel %vm445_vm10, %v1392_v57, %v442_v31 }
 0x552   :  { %v451_v37 = vsel %vm448_vm11, %v450_v36, %v446_v35  ;;  %v387_v42 = vmul.f32 %v384_v29, %v1845_v26 }
 0x553   :  { %v454_v45 = vmul.f32 %v451_v37, %v1849_v32  ;;  %v1918_v32 = vld [vmem:[%s2203_s0 + $0x18] sm:$0xff] }
 0x590   :  { %v390_v25 = vpop.permute.xlu1 %389 }
 0x591   :  { %v392_v30 = vmul.f32 %v390_v25, %v384_v29 }
 0x593   :  { %394 = vrot.lane.b32.xlu0 %v392_v30, %s1563_s24 }
 0x598   :  { %v457_v38 = vpop.permute.xlu2 %456 }
 0x599   :  { %v459_v41 = vmul.f32 %v457_v38, %v451_v37 }
 0x59b   :  { %461 = vrot.lane.b32.xlu1 %v459_v41, %s1563_s24 }
 0x605   :  { %v395_v43 = vpop.permute.xlu0 %394 }
 0x606   :  { %v1901_v44 = vadd.f32 %v395_v43, %v387_v42 }
 0x608   :  { %1393 = vtanh.f32 %v1901_v44 }
 0x60d   :  { %v462_v46 = vpop.permute.xlu1 %461 }
 0x60e   :  { %v1394_v47 = vpop.eup %1393  ;;  %v1905_v48 = vadd.f32 %v462_v46, %v454_v45 }
 0x60f   :  { %400 = vrot.lane.b32.xlu2 %v1394_v47, %s1562_s3 }
 0x610   :  { %1395 = vtanh.f32 %v1905_v48 }
 0x616   :  { %v1396_v49 = vpop.eup %1395 }
 0x617   :  { %467 = vrot.lane.b32.xlu0 %v1396_v49, %s1562_s3 }
 0x669   :  { %v401_v50 = vpop.permute.xlu2 %400 }
 0x66a   :  { %v1910_v26 = vmul.f32 %v401_v50, %v384_v29 }
 0x66c   :  { %474 = vrot.lane.b32.xlu1 %v1910_v26, %s1562_s3 }
 0x689   :  { %v468_v51 = vpop.permute.xlu0 %467 }
 0x68a   :  { %v470_v52 = vmul.f32 %v468_v51, %v451_v37 }
 0x68c   :  { %541 = vrot.lane.b32.xlu2 %v470_v52, %s1562_s3 }
 0x6de   :  { %v475_v53 = vpop.permute.xlu1 %474 }
 0x6df   :  { %v477_v54 = vsel %vm71_vm0, %v1918_v32, %v475_v53 }
 0x6e0   :  { %1314 = vmatmul.msk.f32.vlgmr.msrb.gmra.mxu2 %vm76_vm1, %v477_v54 }
 0x6e1   :  { %1011 = vmatpush.msrb.mxu2 %v1631_v0 }
 0x6e3   :  { %1012 = vmatpush.msrb.mxu2 %v1636_v1 }
 0x6e5   :  { %1013 = vmatpush.msrb.mxu2 %v1645_v3 }
 0x6e6   :  { %v1931_v56 = vpop.permute.xlu2 %541 }
 0x6e7   :  { %v544_v57 = vsel %vm71_vm0, %v1928_v55, %v1931_v56  ;;  %1014 = vmatpush.msrb.mxu2 %v1658_v6 }
 0x6e8   :  { %1317 = vmatmul.msk.f32.vlgmr.msrb.gmra.mxu3 %vm76_vm1, %v544_v57 }
 0x6e9   :  { %1015 = vmatpush.msrb.mxu2 %v1669_v8  ;;  %1076 = vmatpush.msrb.mxu3 %v1639_v2 }
 0x6eb   :  { %1016 = vmatpush.msrb.mxu2 %v1680_v10  ;;  %1077 = vmatpush.msrb.mxu3 %v1648_v4 }
 0x6ed   :  { %1017 = vmatpush.msrb.mxu2 %v1691_v12  ;;  %1078 = vmatpush.msrb.mxu3 %v1652_v5 }
 0x6ef   :  { %1018 = vmatpush.msrb.mxu2 %v1708_v16  ;;  %1079 = vmatpush.msrb.mxu3 %v1663_v7 }
 0x6f1   :  { %1080 = vmatpush.msrb.mxu3 %v1672_v9 }
 0x6f3   :  { %1081 = vmatpush.msrb.mxu3 %v1685_v11 }
 0x6f5   :  { %1082 = vmatpush.msrb.mxu3 %v1699_v14 }
 0x6f7   :  { %1083 = vmatpush.msrb.mxu3 %v1714_v18 }
 0x763   :  { %v498_v0 = vpop.f32.mrf.mxu2 }
 0x764   :  { %v499_v1 = vadd.f32 %v1777_v20, %v498_v0 }
 0x766   :  { %1397 = vtanh.f32 %v499_v1  ;;  %v1315_v6 = vmul.f32 -1.442695, %v499_v1 }
 0x76b   :  { %v565_v2 = vpop.f32.mrf.mxu3 }
 0x76c   :  { %v1398_v3 = vpop.eup %1397  ;;  %v566_v4 = vadd.f32 %v1783_v23, %v565_v2 }
 0x76d   :  { %523 = vrot.lane.b32.xlu0 %v1398_v3, %s1562_s3 }
 0x76e   :  { %1399 = vtanh.f32 %v566_v4  ;;  %v1318_v7 = vmul.f32 -1.442695, %v566_v4 }
 0x76f   :  { %1401 = vpow2.f32 %v1315_v6 }
 0x770   :  { %1403 = vpow2.f32 %v1318_v7 }
 0x774   :  { %v1400_v5 = vpop.eup %1399 }
 0x775   :  { %590 = vrot.lane.b32.xlu1 %v1400_v5, %s1562_s3  ;;  %v1402_v8 = vpop.eup %1401 }
 0x776   :  { %v504_v9 = vadd.f32 1.0, %v1402_v8  ;;  %v1404_v10 = vpop.eup %1403 }
 0x777   :  { %v571_v11 = vadd.f32 1.0, %v1404_v10 }
 0x778   :  { %1405 = vrcp.f32 %v504_v9  ;;  %v516_v63 = vand.u32 2147483648, %v504_v9  ;;  %vm510_vm13 = vweird.f32 %v504_v9  ;;  %v514_v15 = vand.u32 2147483647, %v504_v9 }
 0x779   :  { %1407 = vrcp.f32 %v571_v11  ;;  %v583_v33 = vand.u32 2147483648, %v571_v11  ;;  %vm577_vm3 = vweird.f32 %v571_v11  ;;  %v581_v34 = vand.u32 2147483647, %v571_v11 }
 0x77a   :  { %v517_v22 = vor.u32 1.1754944e-38, %v516_v63  ;;  %vm515_vm15 = vcmp.eq.f32.partialorder %v514_v15, 8.507059e+37 }
 0x77b   :  { %v584_v36 = vor.u32 1.1754944e-38, %v583_v33  ;;  %vm582_vm5 = vcmp.eq.f32.partialorder %v581_v34, 8.507059e+37 }
 0x77e   :  { %v1406_v12 = vpop.eup %1405 }
 0x77f   :  { %v506_v14 = vmul.f32 %v1406_v12, %v504_v9  ;;  %v1408_v18 = vpop.eup %1407  ;;  %vm511_vm12 = vweird.f32 %v1406_v12 }
 0x780   :  { %v573_v59 = vmul.f32 %v1408_v18, %v571_v11  ;;  %vm512_vm14 = vmor %vm510_vm13, %vm511_vm12  ;;  %vm578_vm2 = vweird.f32 %v1408_v18 }
 0x781   :  { %v507_v16 = vsub.f32 1.0, %v506_v14  ;;  %vm579_vm4 = vmor %vm577_vm3, %vm578_vm2 }
 0x782   :  { %v574_v62 = vsub.f32 1.0, %v573_v59 }
 0x783   :  { %v508_v58 = vmul.f32 %v1406_v12, %v507_v16 }
 0x784   :  { %v575_v21 = vmul.f32 %v1408_v18, %v574_v62 }
 0x785   :  { %v509_v61 = vadd.f32 %v1406_v12, %v508_v58 }
 0x786   :  { %v576_v31 = vadd.f32 %v1408_v18, %v575_v21 }
 0x787   :  { %v513_v17 = vsel %vm512_vm14, %v1406_v12, %v509_v61 }
 0x788   :  { %v518_v29 = vsel %vm515_vm15, %v517_v22, %v513_v17  ;;  %v580_v35 = vsel %vm579_vm4, %v1408_v18, %v576_v31 }
 0x789   :  { %v585_v38 = vsel %vm582_vm5, %v584_v36, %v580_v35  ;;  %v521_v42 = vmul.f32 %v518_v29, %v1901_v44 }
 0x78a   :  { %v588_v47 = vmul.f32 %v585_v38, %v1905_v48 }
 0x7df   :  { %v524_v25 = vpop.permute.xlu0 %523 }
 0x7e0   :  { %v526_v30 = vmul.f32 %v524_v25, %v518_v29 }
 0x7e2   :  { %528 = vrot.lane.b32.xlu2 %v526_v30, %s1563_s24 }
 0x7e7   :  { %v591_v37 = vpop.permute.xlu1 %590 }
 0x7e8   :  { %v593_v41 = vmul.f32 %v591_v37, %v585_v38 }
 0x7ea   :  { %595 = vrot.lane.b32.xlu0 %v593_v41, %s1563_s24 }
 0x83c   :  { %v529_v43 = vpop.permute.xlu2 %528 }
 0x83d   :  { %v1957_v45 = vadd.f32 %v529_v43, %v521_v42 }
 0x83f   :  { %1409 = vtanh.f32 %v1957_v45 }
 0x845   :  { %v1410_v46 = vpop.eup %1409 }
 0x846   :  { %534 = vrot.lane.b32.xlu1 %v1410_v46, %s1562_s3 }
 0x85c   :  { %v596_v49 = vpop.permute.xlu0 %595 }
 0x85d   :  { %v1962_v50 = vadd.f32 %v596_v49, %v588_v47 }
 0x85f   :  { %1411 = vtanh.f32 %v1962_v50 }
 0x865   :  { %v1412_v51 = vpop.eup %1411 }
 0x866   :  { %601 = vrot.lane.b32.xlu2 %v1412_v51, %s1562_s3 }
 0x8b8   :  { %v535_v52 = vpop.permute.xlu1 %534 }
 0x8b9   :  { %v1966_v44 = vmul.f32 %v535_v52, %v518_v29 }
 0x8bb   :  { %606 = vrot.lane.b32.xlu0 %v1966_v44, %s1562_s3 }
 0x8c0   :  { %v602_v53 = vpop.permute.xlu2 %601 }
 0x8c1   :  { %v604_v54 = vmul.f32 %v602_v53, %v585_v38 }
 0x8c3   :  { %671 = vrot.lane.b32.xlu1 %v604_v54, %s1562_s3 }
 0x92d   :  { %v607_v57 = vpop.permute.xlu0 %606 }
 0x92e   :  { %v609_v48 = vsel %vm71_vm0, %v1928_v55, %v607_v57 }
 0x92f   :  { %1319 = vmatmul.msk.f32.vlgmr.msra.gmra.mxu0 %vm76_vm1, %v609_v48 }
 0x935   :  { %v1974_v0 = vpop.permute.xlu1 %671 }
 0x936   :  { %v674_v1 = vsel %vm71_vm0, %v1918_v32, %v1974_v0 }
 0x937   :  { %1321 = vmatmul.msk.f32.vlgmr.msra.gmra.mxu1 %vm76_vm1, %v674_v1 }
 0x9ac   :  { %v630_v2 = vpop.f32.mrf.mxu0 }
 0x9ad   :  { %v631_v3 = vadd.f32 %v1777_v20, %v630_v2 }
 0x9af   :  { %1413 = vtanh.f32 %v631_v3  ;;  %v1320_v7 = vmul.f32 -1.442695, %v631_v3 }
 0x9b4   :  { %v695_v4 = vpop.f32.mrf.mxu1 }
 0x9b5   :  { %v1414_v5 = vpop.eup %1413  ;;  %v696_v6 = vadd.f32 %v1783_v23, %v695_v4 }
 0x9b6   :  { %655 = vrot.lane.b32.xlu2 %v1414_v5, %s1562_s3 }
 0x9b7   :  { %1415 = vtanh.f32 %v696_v6  ;;  %v1322_v12 = vmul.f32 -1.442695, %v696_v6 }
 0x9b8   :  { %1417 = vpow2.f32 %v1320_v7 }
 0x9bd   :  { %v1416_v55 = vpop.eup %1415 }
 0x9be   :  { %720 = vrot.lane.b32.xlu0 %v1416_v55, %s1562_s3  ;;  %v1418_v8 = vpop.eup %1417 }
 0x9bf   :  { %v636_v32 = vadd.f32 1.0, %v1418_v8 }
 0x9c1   :  { %1419 = vrcp.f32 %v636_v32  ;;  %v648_v18 = vand.u32 2147483648, %v636_v32  ;;  %vm642_vm7 = vweird.f32 %v636_v32  ;;  %v646_v58 = vand.u32 2147483647, %v636_v32 }
 0x9c2   :  { %1421 = vpow2.f32 %v1322_v12 }
 0x9c3   :  { %v649_v62 = vor.u32 1.1754944e-38, %v648_v18  ;;  %vm647_vm9 = vcmp.eq.f32.partialorder %v646_v58, 8.507059e+37 }
 0x9c7   :  { %v1420_v9 = vpop.eup %1419 }
 0x9c8   :  { %v638_v10 = vmul.f32 %v1420_v9, %v636_v32  ;;  %vm643_vm6 = vweird.f32 %v1420_v9  ;;  %v1422_v59 = vpop.eup %1421 }
 0x9c9   :  { %vm644_vm8 = vmor %vm642_vm7, %vm643_vm6  ;;  %v701_v63 = vadd.f32 1.0, %v1422_v59 }
 0x9ca   :  { %v639_v11 = vsub.f32 1.0, %v638_v10 }
 0x9cb   :  { %1423 = vrcp.f32 %v701_v63  ;;  %v713_v33 = vand.u32 2147483648, %v701_v63  ;;  %vm707_vm11 = vweird.f32 %v701_v63  ;;  %v711_v34 = vand.u32 2147483647, %v701_v63 }
 0x9cc   :  { %v640_v14 = vmul.f32 %v1420_v9, %v639_v11 }
 0x9cd   :  { %v714_v36 = vor.u32 1.1754944e-38, %v713_v33  ;;  %vm712_vm13 = vcmp.eq.f32.partialorder %v711_v34, 8.507059e+37 }
 0x9ce   :  { %v641_v16 = vadd.f32 %v1420_v9, %v640_v14 }
 0x9d0   :  { %v645_v61 = vsel %vm644_vm8, %v1420_v9, %v641_v16 }
 0x9d1   :  { %v650_v15 = vsel %vm647_vm9, %v649_v62, %v645_v61  ;;  %v1424_v22 = vpop.eup %1423 }
 0x9d2   :  { %v703_v25 = vmul.f32 %v1424_v22, %v701_v63  ;;  %vm708_vm10 = vweird.f32 %v1424_v22  ;;  %v653_v42 = vmul.f32 %v650_v15, %v1957_v45 }
 0x9d3   :  { %vm709_vm12 = vmor %vm707_vm11, %vm708_vm10 }
 0x9d4   :  { %v704_v29 = vsub.f32 1.0, %v703_v25 }
 0x9d6   :  { %v705_v30 = vmul.f32 %v1424_v22, %v704_v29 }
 0x9d8   :  { %v706_v31 = vadd.f32 %v1424_v22, %v705_v30 }
 0x9da   :  { %v710_v35 = vsel %vm709_vm12, %v1424_v22, %v706_v31 }
 0x9db   :  { %v715_v38 = vsel %vm712_vm13, %v714_v36, %v710_v35 }
 0x9dc   :  { %v718_v47 = vmul.f32 %v715_v38, %v1962_v50 }
 0xa10   :  { %v656_v17 = vpop.permute.xlu2 %655 }
 0xa11   :  { %v658_v21 = vmul.f32 %v656_v17, %v650_v15 }
 0xa13   :  { %660 = vrot.lane.b32.xlu1 %v658_v21, %s1563_s24 }
 0xa30   :  { %v721_v37 = vpop.permute.xlu0 %720 }
 0xa31   :  { %v723_v41 = vmul.f32 %v721_v37, %v715_v38 }
 0xa33   :  { %725 = vrot.lane.b32.xlu2 %v723_v41, %s1563_s24 }
 0xa85   :  { %v661_v43 = vpop.permute.xlu1 %660 }
 0xa86   :  { %v1987_v46 = vadd.f32 %v661_v43, %v653_v42 }
 0xa88   :  { %1425 = vtanh.f32 %v1987_v46 }
 0xa8d   :  { %v726_v49 = vpop.permute.xlu2 %725 }
 0xa8e   :  { %v1426_v51 = vpop.eup %1425  ;;  %v1991_v52 = vadd.f32 %v726_v49, %v718_v47 }
 0xa8f   :  { %666 = vrot.lane.b32.xlu0 %v1426_v51, %s1562_s3 }
 0xa90   :  { %1427 = vtanh.f32 %v1991_v52 }
 0xa96   :  { %v1428_v53 = vpop.eup %1427 }
 0xa97   :  { %731 = vrot.lane.b32.xlu1 %v1428_v53, %s1562_s3 }
 0xb01   :  { %v667_v54 = vpop.permute.xlu0 %666 }
 0xb02   :  { %v1996_v45 = vmul.f32 %v667_v54, %v650_v15 }
 0xb04   :  { %736 = vrot.lane.b32.xlu2 %v1996_v45, %s1562_s3 }
 0xb09   :  { %v732_v57 = vpop.permute.xlu1 %731 }
 0xb0a   :  { %v734_v48 = vmul.f32 %v732_v57, %v715_v38 }
 0xb0c   :  { %801 = vrot.lane.b32.xlu0 %v734_v48, %s1562_s3 }
 0xb5e   :  { %v737_v50 = vpop.permute.xlu2 %736 }
 0xb5f   :  { %v739_v1 = vsel %vm71_vm0, %v1878_v39, %v737_v50 }
 0xb60   :  { %1323 = vmatmul.msk.f32.vlgmr.msra.gmra.mxu2 %vm76_vm1, %v739_v1 }
 0xb7e   :  { %v2004_v2 = vpop.permute.xlu0 %801 }
 0xb7f   :  { %v804_v3 = vsel %vm71_vm0, %v1862_v13, %v2004_v2 }
 0xb80   :  { %1325 = vmatmul.msk.f32.vlgmr.msra.gmra.mxu3 %vm76_vm1, %v804_v3 }
 0xbe3   :  { %v760_v4 = vpop.f32.mrf.mxu2 }
 0xbe4   :  { %v761_v5 = vadd.f32 %v1777_v20, %v760_v4 }
 0xbe6   :  { %1429 = vtanh.f32 %v761_v5  ;;  %v1324_v8 = vmul.f32 -1.442695, %v761_v5  ;;  %v2043_v5 = vld [vmem:[%s2205_s2] ss:$0 sm:$0xff] }
 0xbec   :  { %v1430_v6 = vpop.eup %1429 }
 0xbed   :  { %785 = vrot.lane.b32.xlu1 %v1430_v6, %s1562_s3 }
 0xc03   :  { %v825_v55 = vpop.f32.mrf.mxu3 }
 0xc04   :  { %v826_v39 = vadd.f32 %v1783_v23, %v825_v55 }
 0xc06   :  { %1431 = vtanh.f32 %v826_v39  ;;  %v1326_v32 = vmul.f32 -1.442695, %v826_v39  ;;  %v2049_v39 = vld [vmem:[%s2207_s4] ss:$0 sm:$0xff] }
 0xc07   :  { %1433 = vpow2.f32 %v1324_v8 }
 0xc08   :  { %1435 = vpow2.f32 %v1326_v32 }
 0xc0c   :  { %v1432_v7 = vpop.eup %1431 }
 0xc0d   :  { %850 = vrot.lane.b32.xlu2 %v1432_v7, %s1562_s3  ;;  %v1434_v13 = vpop.eup %1433 }
 0xc0e   :  { %v766_v9 = vadd.f32 1.0, %v1434_v13  ;;  %v1436_v10 = vpop.eup %1435 }
 0xc0f   :  { %v831_v20 = vadd.f32 1.0, %v1436_v10 }
 0xc10   :  { %1437 = vrcp.f32 %v766_v9  ;;  %v778_v61 = vand.u32 2147483648, %v766_v9  ;;  %vm772_vm15 = vweird.f32 %v766_v9  ;;  %v776_v62 = vand.u32 2147483647, %v766_v9 }
 0xc11   :  { %1439 = vrcp.f32 %v831_v20  ;;  %v843_v30 = vand.u32 2147483648, %v831_v20  ;;  %vm837_vm5 = vweird.f32 %v831_v20  ;;  %v841_v31 = vand.u32 2147483647, %v831_v20 }
 0xc12   :  { %v779_v17 = vor.u32 1.1754944e-38, %v778_v61  ;;  %vm777_vm3 = vcmp.eq.f32.partialorder %v776_v62, 8.507059e+37 }
 0xc13   :  { %v844_v34 = vor.u32 1.1754944e-38, %v843_v30  ;;  %vm842_vm7 = vcmp.eq.f32.partialorder %v841_v31, 8.507059e+37 }
 0xc16   :  { %v1438_v11 = vpop.eup %1437 }
 0xc17   :  { %v768_v12 = vmul.f32 %v1438_v11, %v766_v9  ;;  %v1440_v16 = vpop.eup %1439  ;;  %vm773_vm14 = vweird.f32 %v1438_v11 }
 0xc18   :  { %v833_v23 = vmul.f32 %v1440_v16, %v831_v20  ;;  %vm774_vm2 = vmor %vm772_vm15, %vm773_vm14  ;;  %vm838_vm4 = vweird.f32 %v1440_v16 }
 0xc19   :  { %v769_v14 = vsub.f32 1.0, %v768_v12  ;;  %vm839_vm6 = vmor %vm837_vm5, %vm838_vm4 }
 0xc1a   :  { %v834_v59 = vsub.f32 1.0, %v833_v23 }
 0xc1b   :  { %v770_v18 = vmul.f32 %v1438_v11, %v769_v14 }
 0xc1c   :  { %v835_v15 = vmul.f32 %v1440_v16, %v834_v59 }
 0xc1d   :  { %v771_v58 = vadd.f32 %v1438_v11, %v770_v18 }
 0xc1e   :  { %v836_v29 = vadd.f32 %v1440_v16, %v835_v15 }
 0xc1f   :  { %v775_v63 = vsel %vm774_vm2, %v1438_v11, %v771_v58 }
 0xc20   :  { %v780_v22 = vsel %vm777_vm3, %v779_v17, %v775_v63  ;;  %v840_v33 = vsel %vm839_vm6, %v1440_v16, %v836_v29 }
 0xc21   :  { %v845_v35 = vsel %vm842_vm7, %v844_v34, %v840_v33  ;;  %v783_v38 = vmul.f32 %v780_v22, %v1987_v46 }
 0xc22   :  { %v848_v43 = vmul.f32 %v845_v35, %v1991_v52 }
 0xc5f   :  { %v786_v21 = vpop.permute.xlu1 %785 }
 0xc60   :  { %v788_v25 = vmul.f32 %v786_v21, %v780_v22 }
 0xc62   :  { %790 = vrot.lane.b32.xlu0 %v788_v25, %s1563_s24 }
 0xc67   :  { %v851_v36 = vpop.permute.xlu2 %850 }
 0xc68   :  { %v853_v37 = vmul.f32 %v851_v36, %v845_v35 }
 0xc6a   :  { %855 = vrot.lane.b32.xlu1 %v853_v37, %s1563_s24 }
 0xcd4   :  { %v791_v41 = vpop.permute.xlu0 %790 }
 0xcd5   :  { %v2017_v42 = vadd.f32 %v791_v41, %v783_v38 }
 0xcd7   :  { %1441 = vtanh.f32 %v2017_v42 }
 0xcdc   :  { %v856_v47 = vpop.permute.xlu1 %855 }
 0xcdd   :  { %v1442_v49 = vpop.eup %1441  ;;  %v2021_v51 = vadd.f32 %v856_v47, %v848_v43 }
 0xcde   :  { %796 = vrot.lane.b32.xlu2 %v1442_v49, %s1562_s3 }
 0xcdf   :  { %1443 = vtanh.f32 %v2021_v51 }
 0xce5   :  { %v1444_v53 = vpop.eup %1443 }
 0xce6   :  { %861 = vrot.lane.b32.xlu0 %v1444_v53, %s1562_s3 }
 0xd38   :  { %v797_v54 = vpop.permute.xlu2 %796 }
 0xd39   :  { %v2026_v46 = vmul.f32 %v797_v54, %v780_v22 }
 0xd3b   :  { %866 = vrot.lane.b32.xlu1 %v2026_v46, %s1562_s3 }
 0xd58   :  { %v862_v57 = vpop.permute.xlu0 %861 }
 0xd59   :  { %v864_v48 = vmul.f32 %v862_v57, %v845_v35 }
 0xd5b   :  { %931 = vrot.lane.b32.xlu2 %v864_v48, %s1562_s3 }
 0xdad   :  { %v867_v52 = vpop.permute.xlu1 %866 }
 0xdae   :  { %v869_v50 = vsel %vm71_vm0, %v1816_v27, %v867_v52 }
 0xdaf   :  { %1327 = vmatmul.msk.f32.vlgmr.msrb.gmra.mxu0 %vm76_vm1, %v869_v50 }
 0xdb5   :  { %v2034_v1 = vpop.permute.xlu2 %931 }
 0xdb6   :  { %v934_v3 = vsel %vm71_vm0, %v1806_v24, %v2034_v1 }
 0xdb7   :  { %1329 = vmatmul.msk.f32.vlgmr.msrb.gmra.mxu1 %vm76_vm1, %v934_v3 }
 0xe2c   :  { %v890_v4 = vpop.f32.mrf.mxu0 }
 0xe2d   :  { %v891_v6 = vadd.f32 %v2043_v5, %v890_v4 }
 0xe2f   :  { %1445 = vtanh.f32 %v891_v6  ;;  %v1328_v8 = vmul.f32 -1.442695, %v891_v6 }
 0xe34   :  { %v955_v27 = vpop.f32.mrf.mxu1 }
 0xe35   :  { %v1446_v55 = vpop.eup %1445  ;;  %v956_v24 = vadd.f32 %v2049_v39, %v955_v27  ;;  %v1480_v27 = vld [vmem:[%s2203_s0] sm:$0xff] }
 0xe36   :  { %915 = vrot.lane.b32.xlu0 %v1446_v55, %s1562_s3 }
 0xe37   :  { %1447 = vtanh.f32 %v956_v24  ;;  %v1330_v32 = vmul.f32 -1.442695, %v956_v24 }
 0xe38   :  { %1449 = vpow2.f32 %v1328_v8 }
 0xe39   :  { %1451 = vpow2.f32 %v1330_v32 }
 0xe3d   :  { %v1448_v7 = vpop.eup %1447 }
 0xe3e   :  { %980 = vrot.lane.b32.xlu1 %v1448_v7, %s1562_s3  ;;  %v1450_v13 = vpop.eup %1449 }
 0xe3f   :  { %v896_v9 = vadd.f32 1.0, %v1450_v13  ;;  %v1452_v10 = vpop.eup %1451 }
 0xe40   :  { %v961_v20 = vadd.f32 1.0, %v1452_v10 }
 0xe41   :  { %1453 = vrcp.f32 %v896_v9  ;;  %v908_v61 = vand.u32 2147483648, %v896_v9  ;;  %vm902_vm9 = vweird.f32 %v896_v9  ;;  %v906_v62 = vand.u32 2147483647, %v896_v9 }
 0xe42   :  { %1455 = vrcp.f32 %v961_v20  ;;  %v973_v30 = vand.u32 2147483648, %v961_v20  ;;  %vm967_vm13 = vweird.f32 %v961_v20  ;;  %v971_v31 = vand.u32 2147483647, %v961_v20 }
 0xe43   :  { %v909_v17 = vor.u32 1.1754944e-38, %v908_v61  ;;  %vm907_vm11 = vcmp.eq.f32.partialorder %v906_v62, 8.507059e+37 }
 0xe44   :  { %v974_v34 = vor.u32 1.1754944e-38, %v973_v30  ;;  %vm972_vm15 = vcmp.eq.f32.partialorder %v971_v31, 8.507059e+37 }
 0xe47   :  { %v1454_v11 = vpop.eup %1453 }
 0xe48   :  { %v898_v12 = vmul.f32 %v1454_v11, %v896_v9  ;;  %v1456_v16 = vpop.eup %1455  ;;  %vm903_vm8 = vweird.f32 %v1454_v11 }
 0xe49   :  { %v963_v23 = vmul.f32 %v1456_v16, %v961_v20  ;;  %vm904_vm10 = vmor %vm902_vm9, %vm903_vm8  ;;  %vm968_vm12 = vweird.f32 %v1456_v16 }
 0xe4a   :  { %v899_v14 = vsub.f32 1.0, %v898_v12  ;;  %vm969_vm14 = vmor %vm967_vm13, %vm968_vm12 }
 0xe4b   :  { %v964_v59 = vsub.f32 1.0, %v963_v23 }
 0xe4c   :  { %v900_v18 = vmul.f32 %v1454_v11, %v899_v14 }
 0xe4d   :  { %v965_v15 = vmul.f32 %v1456_v16, %v964_v59 }
 0xe4e   :  { %v901_v58 = vadd.f32 %v1454_v11, %v900_v18 }
 0xe4f   :  { %v966_v29 = vadd.f32 %v1456_v16, %v965_v15 }
 0xe50   :  { %v905_v63 = vsel %vm904_vm10, %v1454_v11, %v901_v58 }
 0xe51   :  { %v910_v22 = vsel %vm907_vm11, %v909_v17, %v905_v63  ;;  %v970_v33 = vsel %vm969_vm14, %v1456_v16, %v966_v29 }
 0xe52   :  { %v975_v36 = vsel %vm972_vm15, %v974_v34, %v970_v33  ;;  %v913_v38 = vmul.f32 %v910_v22, %v2017_v42 }
 0xe53   :  { %v978_v49 = vmul.f32 %v975_v36, %v2021_v51  ;;  %v1479_v51 = vld [vmem:[%s2203_s0 + $0x38] sm:$0xff]  ;;  %s1564_s0 = smov 96  }
 0xea8   :  { %v916_v21 = vpop.permute.xlu0 %915 }
 0xea9   :  { %v918_v25 = vmul.f32 %v916_v21, %v910_v22 }
 0xeab   :  { %920 = vrot.lane.b32.xlu2 %v918_v25, %s1563_s24 }
 0xeb0   :  { %v981_v35 = vpop.permute.xlu1 %980 }
 0xeb1   :  { %v983_v37 = vmul.f32 %v981_v35, %v975_v36 }
 0xeb3   :  { %985 = vrot.lane.b32.xlu0 %v983_v37, %s1563_s24 }
 0xf05   :  { %v921_v41 = vpop.permute.xlu2 %920 }
 0xf06   :  { %v2057_v43 = vadd.f32 %v921_v41, %v913_v38 }
 0xf08   :  { %1457 = vtanh.f32 %v2057_v43 }
 0xf0e   :  { %v1458_v47 = vpop.eup %1457 }
 0xf0f   :  { %926 = vrot.lane.b32.xlu1 %v1458_v47, %s1562_s3 }
 0xf25   :  { %v986_v53 = vpop.permute.xlu0 %985 }
 0xf26   :  { %v2062_v54 = vadd.f32 %v986_v53, %v978_v49 }
 0xf28   :  { %1459 = vtanh.f32 %v2062_v54 }
 0xf2e   :  { %v1460_v57 = vpop.eup %1459 }
 0xf2f   :  { %991 = vrot.lane.b32.xlu2 %v1460_v57, %s1562_s3 }
 0xf81   :  { %v927_v48 = vpop.permute.xlu1 %926 }
 0xf82   :  { %v2066_v42 = vmul.f32 %v927_v48, %v910_v22 }
 0xf84   :  { %996 = vrot.lane.b32.xlu0 %v2066_v42, %s1562_s3 }
 0xf89   :  { %v992_v52 = vpop.permute.xlu2 %991 }
 0xf8a   :  { %v994_v50 = vmul.f32 %v992_v52, %v975_v36 }
 0xf8c   :  { %1061 = vrot.lane.b32.xlu1 %v994_v50, %s1562_s3 }
 0xff6   :  { %v997_v3 = vpop.permute.xlu0 %996 }
 0xff7   :  { %v999_v4 = vsel %vm71_vm0, %v1479_v51, %v997_v3  ;;  %v1188_v51 = vld [vmem:[%s2208_s5 + $0x28] sm:$0xff] }
 0xff8   :  { %1331 = vmatmul.msk.f32.vlgmr.msrb.gmra.mxu2 %vm76_vm1, %v999_v4  ;;  %v1185_v4 = vld [vmem:[%s2208_s5 + $0x10] sm:$0xff] }
 0xffe   :  { %v2076_v6 = vpop.permute.xlu1 %1061 }
 0xfff   :  { %v1064_v55 = vsel %vm71_vm0, %v1480_v27, %v2076_v6  ;;  %v1184_v27 = vld [vmem:[%s2208_s5 + $0x8] sm:$0xff] }
0x1000   :  { %1333 = vmatmul.msk.f32.vlgmr.msrb.gmra.mxu3 %vm76_vm1, %v1064_v55  ;;  %v1183_v55 = vld [vmem:[%s2208_s5] sm:$0xff] }
0x107b   :  { %v1020_v24 = vpop.f32.mrf.mxu2 }
0x107c   :  { %v1021_v7 = vadd.f32 %v2043_v5, %v1020_v24 }
0x107e   :  { %1461 = vtanh.f32 %v1021_v7  ;;  %v1332_v10 = vmul.f32 -1.442695, %v1021_v7 }
0x1083   :  { %v1085_v8 = vpop.f32.mrf.mxu3 }
0x1084   :  { %v1462_v32 = vpop.eup %1461  ;;  %v1086_v13 = vadd.f32 %v2049_v39, %v1085_v8 }
0x1085   :  { %1045 = vrot.lane.b32.xlu2 %v1462_v32, %s1562_s3 }
0x1086   :  { %1463 = vtanh.f32 %v1086_v13  ;;  %v1334_v5 = vmul.f32 -1.442695, %v1086_v13 }
0x1087   :  { %1465 = vpow2.f32 %v1332_v10 }
0x108c   :  { %v1464_v9 = vpop.eup %1463 }
0x108d   :  { %1110 = vrot.lane.b32.xlu0 %v1464_v9, %s1562_s3  ;;  %v1466_v20 = vpop.eup %1465 }
0x108e   :  { %v1026_v11 = vadd.f32 1.0, %v1466_v20 }
0x1090   :  { %1467 = vrcp.f32 %v1026_v11  ;;  %v1038_v39 = vand.u32 2147483648, %v1026_v11  ;;  %vm1032_vm3 = vweird.f32 %v1026_v11  ;;  %v1036_v58 = vand.u32 2147483647, %v1026_v11 }
0x1091   :  { %1469 = vpow2.f32 %v1334_v5 }
0x1092   :  { %v1039_v62 = vor.u32 1.1754944e-38, %v1038_v39  ;;  %vm1037_vm5 = vcmp.eq.f32.partialorder %v1036_v58, 8.507059e+37 }
0x1096   :  { %v1468_v12 = vpop.eup %1467 }
0x1097   :  { %v1028_v14 = vmul.f32 %v1468_v12, %v1026_v11  ;;  %vm1033_vm2 = vweird.f32 %v1468_v12  ;;  %v1470_v59 = vpop.eup %1469 }
0x1098   :  { %vm1034_vm4 = vmor %vm1032_vm3, %vm1033_vm2  ;;  %v1091_v63 = vadd.f32 1.0, %v1470_v59 }
0x1099   :  { %v1029_v16 = vsub.f32 1.0, %v1028_v14  ;;  %v1219_v14 = vld [vmem:[%s2210_s7] sm:$0xff] }
0x109a   :  { %1471 = vrcp.f32 %v1091_v63  ;;  %v1103_v33 = vand.u32 2147483648, %v1091_v63  ;;  %vm1097_vm7 = vweird.f32 %v1091_v63  ;;  %v1101_v34 = vand.u32 2147483647, %v1091_v63 }
0x109b   :  { %v1030_v18 = vmul.f32 %v1468_v12, %v1029_v16 }
0x109c   :  { %v1104_v36 = vor.u32 1.1754944e-38, %v1103_v33  ;;  %vm1102_vm9 = vcmp.eq.f32.partialorder %v1101_v34, 8.507059e+37 }
0x109d   :  { %v1031_v23 = vadd.f32 %v1468_v12, %v1030_v18 }
0x109f   :  { %v1035_v61 = vsel %vm1034_vm4, %v1468_v12, %v1031_v23  ;;  %v1220_v12 = vld [vmem:[%s2210_s7 + $0x8] sm:$0xff] }
0x10a0   :  { %v1040_v15 = vsel %vm1037_vm5, %v1039_v62, %v1035_v61  ;;  %v1472_v22 = vpop.eup %1471 }
0x10a1   :  { %v1093_v25 = vmul.f32 %v1472_v22, %v1091_v63  ;;  %vm1098_vm6 = vweird.f32 %v1472_v22  ;;  %v1043_v47 = vmul.f32 %v1040_v15, %v2057_v43  ;;  %v1190_v43 = vld [vmem:[%s2208_s5 + $0x38] sm:$0xff] }
0x10a2   :  { %vm1099_vm8 = vmor %vm1097_vm7, %vm1098_vm6  ;;  %1206 = vmatpush.msra.mxu0 %v1190_v43 }
0x10a3   :  { %v1094_v29 = vsub.f32 1.0, %v1093_v25 }
0x10a5   :  { %v1095_v30 = vmul.f32 %v1472_v22, %v1094_v29 }
0x10a7   :  { %v1096_v31 = vadd.f32 %v1472_v22, %v1095_v30 }
0x10a9   :  { %v1100_v35 = vsel %vm1099_vm8, %v1472_v22, %v1096_v31  ;;  %v1347_v22 = vld [vmem:[%s2209_s6] ss:$0 sm:$0xff] }
0x10aa   :  { %v1105_v38 = vsel %vm1102_vm9, %v1104_v36, %v1100_v35 }
0x10ab   :  { %v1108_v57 = vmul.f32 %v1105_v38, %v2062_v54  ;;  %v1189_v54 = vld [vmem:[%s2208_s5 + $0x30] sm:$0xff] }
0x10ac   :  { %1207 = vmatpush.msra.mxu0 %v1189_v54 }
0x10ae   :  { %1208 = vmatpush.msra.mxu0 %v1188_v51 }
0x10df   :  { %v1046_v17 = vpop.permute.xlu2 %1045 }
0x10e0   :  { %v1048_v21 = vmul.f32 %v1046_v17, %v1040_v15 }
0x10e2   :  { %1050 = vrot.lane.b32.xlu1 %v1048_v21, %s1563_s24 }
0x10ff   :  { %v1111_v37 = vpop.permute.xlu0 %1110 }
0x1100   :  { %v1113_v41 = vmul.f32 %v1111_v37, %v1105_v38 }
0x1102   :  { %1115 = vrot.lane.b32.xlu2 %v1113_v41, %s1563_s24 }
0x1154   :  { %v1051_v49 = vpop.permute.xlu1 %1050 }
0x1155   :  { %v1053_v53 = vadd.f32 %v1051_v49, %v1043_v47 }
0x1157   :  { %1473 = vtanh.f32 %v1053_v53 }
0x115c   :  { %v1116_v48 = vpop.permute.xlu2 %1115 }
0x115d   :  { %v1474_v52 = vpop.eup %1473  ;;  %v1118_v50 = vadd.f32 %v1116_v48, %v1108_v57 }
0x115e   :  { %1056 = vrot.lane.b32.xlu0 %v1474_v52, %s1562_s3 }
0x115f   :  { %1475 = vtanh.f32 %v1118_v50 }
0x1165   :  { %v1476_v3 = vpop.eup %1475 }
0x1166   :  { %1121 = vrot.lane.b32.xlu1 %v1476_v3, %s1562_s3 }
0x116e   :  { %1178 = vrot.lane.b32.xlu1 %v1053_v53, %s1564_s0 }
0x1176   :  { %1140 = vrot.lane.b32.xlu1 %v1910_v26, %s1563_s24  ;;  %v1187_v26 = vld [vmem:[%s2208_s5 + $0x20] sm:$0xff] }
0x1177   :  { %1209 = vmatpush.msra.mxu0 %v1187_v26 }
0x117e   :  { %1158 = vrot.lane.b32.xlu1 %v2026_v46, %s1563_s24  ;;  %v1186_v46 = vld [vmem:[%s2208_s5 + $0x18] sm:$0xff] }
0x117f   :  { %1210 = vmatpush.msra.mxu0 %v1186_v46 }
0x1181   :  { %1211 = vmatpush.msra.mxu0 %v1185_v4 }
0x1183   :  { %1212 = vmatpush.msra.mxu0 %v1184_v27 }
0x1185   :  { %1213 = vmatpush.msra.mxu0 %v1183_v55 }
0x11d0   :  { %v1057_v24 = vpop.permute.xlu0 %1056 }
0x11d1   :  { %v1059_v7 = vmul.f32 %v1057_v24, %v1040_v15 }
0x11d3   :  { %1171 = vrot.lane.b32.xlu0 %v1059_v7, %s1563_s24 }
0x11d8   :  { %v1122_v8 = vpop.permute.xlu1 %1121 }
0x11d9   :  { %v1124_v32 = vmul.f32 %v1122_v8, %v1105_v38 }
0x11db   :  { %1134 = vrot.lane.b32.xlu0 %v1854_v60, %s1563_s24  ;;  %1129 = vrot.lane.b32.xlu2 %v1124_v32, %s1562_s3  ;;  %s1279_s3 = sshll.u32 %s1566_s9, 4  ;;  %s1280_s3 = int_to_ptr.vmem [resolvable:$true] %s1279_s3 }
0x11e0   :  { %v1179_v13 = vpop.permute.xlu1 %1178 }
0x11e1   :  { %v1181_v9 = vsel %vm71_vm0, %v1179_v13, %v1118_v50 }
0x11e2   :  { %1335 = vmatmul.msk.f32.vlgmr.msra.gmra.mxu0 %vm76_vm1, %v1181_v9 }
0x11e3   :  { %1152 = vrot.lane.b32.xlu0 %v1996_v45, %s1563_s24  ;;  %1125 = vrot.lane.b32.xlu2 %v1798_v19, %s1563_s24  ;;  %v1226_v19 = vld [vmem:[%s2210_s7 + $0x38] sm:$0xff]  ;;  %v1225_v45 = vld [vmem:[%s2210_s7 + $0x30] sm:$0xff] }
0x11e4   :  { %1242 = vmatpush.msra.mxu1 %v1226_v19 }
0x11e6   :  { %1243 = vmatpush.msra.mxu1 %v1225_v45 }
0x11e8   :  { %v1141_v10 = vpop.permute.xlu1 %1140 }
0x11e9   :  { %v1143_v20 = vsel %vm71_vm0, %v1141_v10, %v2034_v1  ;;  %v1222_v1 = vld [vmem:[%s2210_s7 + $0x18] sm:$0xff] }
0x11ea   :  { %1145 = vst.msk [vmem:[#allocation5 + $0x10] sm:$0xff] %vm76_vm1, %v1143_v20 }
0x11eb   :  { %1146 = vrot.lane.b32.xlu2 %v1966_v44, %s1563_s24  ;;  %v1224_v44 = vld [vmem:[%s2210_s7 + $0x28] sm:$0xff] }
0x11ec   :  { %1244 = vmatpush.msra.mxu1 %v1224_v44 }
0x11f0   :  { %v1159_v60 = vpop.permute.xlu1 %1158 }
0x11f1   :  { %v1161_v11 = vsel %vm71_vm0, %v1159_v60, %v1931_v56  ;;  %v1223_v56 = vld [vmem:[%s2210_s7 + $0x20] sm:$0xff] }
0x11f2   :  { %1163 = vst.msk [vmem:[#allocation5 + $0x28] sm:$0xff] %vm76_vm1, %v1161_v11  ;;  %1245 = vmatpush.msra.mxu1 %v1223_v56 }
0x11f3   :  { %1164 = vrot.lane.b32.xlu2 %v2066_v42, %s1563_s24  ;;  %v1221_v42 = vld [vmem:[%s2210_s7 + $0x10] sm:$0xff]  ;;  %s1565_s7 = smov [#allocation5]  }
0x11f4   :  { %1246 = vmatpush.msra.mxu1 %v1222_v1  ;;  %s1265_s14 = sshll.u32 %s1565_s7, 4  ;;  %s1266_s14 = int_to_ptr.vmem [resolvable:$true] %s1265_s14 }
0x11f6   :  { %1247 = vmatpush.msra.mxu1 %v1221_v42 }
0x11f8   :  { %1248 = vmatpush.msra.mxu1 %v1220_v12 }
0x11fa   :  { %1249 = vmatpush.msra.mxu1 %v1219_v14 }
0x1235   :  { %v1130_v16 = vpop.permute.xlu2 %1129 }
0x123d   :  { %v1126_v5 = vpop.permute.xlu2 %1125 }
0x123e   :  { %v1132_v18 = vsel %vm71_vm0, %v1126_v5, %v1130_v16 }
0x123f   :  { %1133 = vst.msk [vmem:[#allocation5] sm:$0xff] %vm76_vm1, %v1132_v18 }
0x1245   :  { %v1172_v23 = vpop.permute.xlu0 %1171  ;;  %v1147_v39 = vpop.permute.xlu2 %1146 }
0x1246   :  { %v1174_v58 = vsel %vm71_vm0, %v1172_v23, %v1819_v28  ;;  %v1182_v59 = vsel %vm71_vm0, %v1172_v23, %v1130_v16  ;;  %v1149_v61 = vsel %vm71_vm0, %v1147_v39, %v2004_v2 }
0x1247   :  { %1176 = vst.msk [vmem:[#allocation5 + $0x38] sm:$0xff] %vm76_vm1, %v1174_v58  ;;  %1336 = vmatmul.msk.f32.vlgmr.msra.gmra.mxu1 %vm76_vm1, %v1182_v59 }
0x1248   :  { %1151 = vst.msk [vmem:[#allocation5 + $0x18] sm:$0xff] %vm76_vm1, %v1149_v61 }
0x124d   :  { %v1135_v62 = vpop.permute.xlu0 %1134  ;;  %v1165_v63 = vpop.permute.xlu2 %1164 }
0x124e   :  { %v1137_v15 = vsel %vm71_vm0, %v1135_v62, %v2076_v6  ;;  %v1167_v17 = vsel %vm71_vm0, %v1165_v63, %v1880_v40  ;;  %v1348_v40 = vld [vmem:[%s2211_s8] ss:$0 sm:$0xff] }
0x124f   :  { %1139 = vst.msk [vmem:[#allocation5 + $0x8] sm:$0xff] %vm76_vm1, %v1137_v15 }
0x1250   :  { %1169 = vst.msk [vmem:[#allocation5 + $0x30] sm:$0xff] %vm76_vm1, %v1167_v17 }
0x1255   :  { %v1153_v28 = vpop.permute.xlu0 %1152 }
0x1256   :  { %v1155_v2 = vsel %vm71_vm0, %v1153_v28, %v1974_v0 }
0x1257   :  { %1157 = vst.msk [vmem:[#allocation5 + $0x20] sm:$0xff] %vm76_vm1, %v1155_v2 }
0x1258   :  { %1273 = dma.vmem_to_hbm [thread:$0]  %s1266_s14, 1024, %s1268_s17, [#allocation4], %s1560_s18, %s1560_s18, %s1561_s19  }
0x1259   :  { %s1281_s18 = sshll.u32 %s2213_s10, 4  ;;  %s1282_s18 = int_to_ptr.hbm [resolvable:$true] %s1281_s18 }
0x125f   :  { %v1215_v25 = vpop.f32.mrf.mxu0 }
0x1260   :  { %v1216_v29 = vadd.f32 %v1347_v22, %v1215_v25 }
0x1262   :  { %v1218_v30 = vmax.f32 %v1216_v29, 0.0 }
0x12c4   :  { %v1251_v6 = vpop.f32.mrf.mxu1 }
0x12c5   :  { %v1252_v0 = vadd.f32 %v1348_v40, %v1251_v6 }
0x12c7   :  { %v1254_v21 = vmax.f32 %v1252_v0, 0.0 }
0x12c9   :  { %1256 = vrot.lane.b32.xlu0 %v1254_v21, %s1563_s24 }
0x133b   :  { %v1257_v31 = vpop.permute.xlu0 %1256 }
0x133c   :  { %v1259_v33 = vsel %vm71_vm0, %v1218_v30, %v1257_v31 }
0x133d   :  { %1260 = vst.msk [vmem:[#allocation6] sm:$0xff] %vm76_vm1, %v1259_v33 }
0x133e   :  { %1284 = dma.vmem_to_hbm [thread:$0]  %s1280_s3, 128, %s1282_s18, [#allocation7]  }
0x133f   :  { %1555 = dma.done.wait [#allocation4], 1024  }
0x1340   :  { %1556 = vsyncadd [#allocation4], 4294966272 }
0x1341   :  { %1557 = dma.done.wait [#allocation7], 128  }
0x1342   :  { %1558 = vsyncadd [#allocation7], 4294967168 }
0x1343   :  { %1293 = vsyncpa [#allocation3], 1 }
0x1344   :  { %1294 = vsyncpa [#allocation4], 1 }
0x1345   :  { %1295 = vsyncpa [#allocation7], 1 }

</bundles_post_ra>
